<compile_context>
chip_gen: v7x
topology: tpu7x:2x2x1
jax: 0.10.0
libtpu: 0.0.40
codegen_flags: <defaults>
</compile_context>

<pallas_src>
import numpy as np
import jax
import jax.numpy as jnp
from jax.experimental import pallas as pl
from jax.experimental.pallas import tpu as pltpu


# ----------------------------------------------------------------------------
# Pallas kernel: one tile of TM packed rows (k flat angles each) -> (TM, P=k*d)
# lane-dense embeddings.
# ----------------------------------------------------------------------------
def angle_embedding_kernel(a_ref, sel_ref, ws_ref, wc_ref, b_ref, out_ref):
    # a_ref:   (TM, k)   packed angles (k flat angles per packed row), f32
    # sel_ref: (k, PH)   block-diagonal spread of factor * div_term (PH = k*d/2)
    # ws_ref:  (PH, P)   block-diagonal sin-part of W.T (rows 0::2), P = k*d
    # wc_ref:  (PH, P)   block-diagonal cos-part of W.T (rows 1::2)
    # b_ref:   (1, P)    bias tiled k times
    # out_ref: (TM, P)   lane-dense packed output (P = 128 when d <= 128)
    omegas = jnp.dot(a_ref[...], sel_ref[...],
                     preferred_element_type=jnp.float32)          # (TM, PH)
    s = jnp.sin(omegas)                                           # EUP
    c = jnp.cos(omegas)
    out_ref[...] = (
        jnp.dot(s, ws_ref[...], preferred_element_type=jnp.float32)
        + jnp.dot(c, wc_ref[...], preferred_element_type=jnp.float32)
        + b_ref[...]
    )


# ----------------------------------------------------------------------------
# Tile selection: big tiles to amortize ~0.35us/step; >=2 steps for v7x's 2 TCs.
# ----------------------------------------------------------------------------
def _round_up(x, m):
    return ((x + m - 1) // m) * m


def _choose_tile(mp_rows, max_tile):
    if mp_rows <= 8:
        return mp_rows                       # single step, block == full extent
    return min(max_tile, _round_up(pl.cdiv(mp_rows, 2), 8))


# ----------------------------------------------------------------------------
# Wrapper: flatten arbitrary-shape angles, pack k per row, tile over a 1-D
# "parallel" grid, unpack with a free contiguous reshape.
# ----------------------------------------------------------------------------
def angle_embedding_forward(angles, params, *, max_tile_rows=2048):
    d, k, P, PH = params['d'], params['k'], params['P'], params['PH']
    in_shape = angles.shape
    a_flat = angles.reshape(-1).astype(jnp.float32)
    M = a_flat.shape[0]

    pad = (-M) % k                           # at most k-1 scalar angles
    if pad:
        a_flat = jnp.pad(a_flat, (0, pad))
    Mp = (M + pad) // k
    a2 = a_flat.reshape(Mp, k)

    tile = _choose_tile(Mp, max_tile_rows)
    grid = (pl.cdiv(Mp, tile),)

    cost = pl.CostEstimate(
        flops=int(Mp * (2 * k * PH + 4 * PH * P)),
        transcendentals=int(2 * Mp * PH),
        bytes_accessed=int(4 * (Mp * k + Mp * P + k * PH + 2 * PH * P + P)),
    )

    out = pl.pallas_call(
        angle_embedding_kernel,
        out_shape=jax.ShapeDtypeStruct((Mp, P), jnp.float32),
        grid=grid,
        in_specs=[
            pl.BlockSpec((tile, k), lambda i: (i, 0)),    # packed angles
            pl.BlockSpec((k, PH), lambda i: (0, 0)),      # selector
            pl.BlockSpec((PH, P), lambda i: (0, 0)),      # sin weight block
            pl.BlockSpec((PH, P), lambda i: (0, 0)),      # cos weight block
            pl.BlockSpec((1, P), lambda i: (0, 0)),       # bias (tiled)
        ],
        out_specs=pl.BlockSpec((tile, P), lambda i: (i, 0)),
        compiler_params=pltpu.CompilerParams(
            dimension_semantics=("parallel",),
            vmem_limit_bytes=32 * 1024 * 1024),
        cost_estimate=cost,
    )(a2, params['selector'], params['w_sin_big'], params['w_cos_big'],
      params['bias_packed'])

    out_flat = out.reshape(Mp * k, d)        # free contiguous view
    if pad:
        out_flat = out_flat[:M]
    return out_flat.reshape(*in_shape, d)


def angle_embedding_forward_multi(angle_list, params, **kw):
    """Run several angle tensors through ONE pallas_call (single launch)."""
    flats = [a.reshape(-1).astype(jnp.float32) for a in angle_list]
    sizes = [int(f.shape[0]) for f in flats]
    combined = jnp.concatenate(flats)
    out = angle_embedding_forward(combined, params, **kw)   # (sum(M_i), d)
    results, off = [], 0
    for a, m in zip(angle_list, sizes):
        results.append(out[off:off + m].reshape(*a.shape, params['d']))
        off += m
    return results


# ----------------------------------------------------------------------------
# Parameter setup (deterministic; mirrors nn.Linear default init) + host-side
# block-diagonal packing that absorbs the torch interleave AND the lane packing.
# ----------------------------------------------------------------------------
def init_angle_embedding_params(key, hidden_dim, sigma):
    assert hidden_dim % 2 == 0, "Sinusoidal embedding needs even hidden_dim"
    d = hidden_dim
    half = d // 2
    kw, kb = jax.random.split(key)
    bound = 1.0 / np.sqrt(d)
    w = jax.random.uniform(kw, (d, d), jnp.float32, -bound, bound)  # (out, in)
    b = jax.random.uniform(kb, (d,), jnp.float32, -bound, bound)

    div_indices = np.arange(0, d, 2, dtype=np.float32)
    div_term = np.exp(div_indices * (-np.log(10000.0) / d)).astype(np.float32)
    factor = np.float32(180.0 / (np.pi * sigma))
    div_scaled = (factor * div_term).astype(np.float32)

    # k flat rows packed per 128-wide output row (k=1 if d >= 128).
    k = max(1, 128 // d)
    P, PH = k * d, k * half

    wt = np.asarray(jax.device_get(w)).T.astype(np.float32)   # (d_in, d_out)
    wt_sin = wt[0::2, :]    # rows hit by sin_f (torch interleaved col 2f)
    wt_cos = wt[1::2, :]    # rows hit by cos_f (torch interleaved col 2f+1)

    selector = np.zeros((k, PH), np.float32)
    w_sin_big = np.zeros((PH, P), np.float32)
    w_cos_big = np.zeros((PH, P), np.float32)
    for j in range(k):
        selector[j, j * half:(j + 1) * half] = div_scaled
        w_sin_big[j * half:(j + 1) * half, j * d:(j + 1) * d] = wt_sin
        w_cos_big[j * half:(j + 1) * half, j * d:(j + 1) * d] = wt_cos
    bias_packed = np.tile(np.asarray(jax.device_get(b)), k).reshape(1, P)

    return dict(
        d=d, half=half, k=k, P=P, PH=PH,
        selector=jnp.asarray(selector),
        w_sin_big=jnp.asarray(w_sin_big),
        w_cos_big=jnp.asarray(w_cos_big),
        bias_packed=jnp.asarray(bias_packed.astype(np.float32)),
        # raw params kept for the pure-JAX reference check
        w=w, b=b, div_term=jnp.asarray(div_term), factor=factor)


# ----------------------------------------------------------------------------
# Pure-JAX reference (bit-faithful to the torch module) for verification.
# ----------------------------------------------------------------------------
def angle_embedding_reference(angles, params):
    a = angles.astype(jnp.float32) * params['factor']
    omegas = a[..., None] * params['div_term']                      # (..., d/2)
    emb = jnp.stack([jnp.sin(omegas), jnp.cos(omegas)], axis=-1)    # (..., d/2, 2)
    emb = emb.reshape(*a.shape, params['d'])                        # interleaved
    return emb @ params['w'].T + params['b']


if __name__ == "__main__":
    hidden_dim, sigma = 32, 15
    B, N = 2, 16

    key = jax.random.PRNGKey(0)
    k_par, k_a1, k_a2 = jax.random.split(key, 3)
    params = init_angle_embedding_params(k_par, hidden_dim, sigma)

    # Angle tensors as used by the surrounding model: pairwise self-angles
    # (B, N, N) and per-point cross-angles (B, N).
    angle_self = jax.random.uniform(k_a1, (B, N, N), jnp.float32, 0.0, np.pi)
    angle_cross = jax.random.uniform(k_a2, (B, N), jnp.float32, 0.0, np.pi)

    # Both tensors share a single fused pallas_call.
    out_self, out_cross = angle_embedding_forward_multi(
        [angle_self, angle_cross], params)
    out_self, out_cross = jax.block_until_ready((out_self, out_cross))

    assert out_self.shape == (B, N, N, hidden_dim), out_self.shape
    assert out_cross.shape == (B, N, hidden_dim), out_cross.shape
    assert bool(jnp.all(jnp.isfinite(out_self)))
    assert bool(jnp.all(jnp.isfinite(out_cross)))

    ref_self = angle_embedding_reference(angle_self, params)
    ref_cross = angle_embedding_reference(angle_cross, params)
    err_self = float(jnp.max(jnp.abs(out_self - ref_self)))
    err_cross = float(jnp.max(jnp.abs(out_cross - ref_cross)))
    assert jnp.allclose(out_self, ref_self, atol=1e-4, rtol=1e-4), err_self
    assert jnp.allclose(out_cross, ref_cross, atol=1e-4, rtol=1e-4), err_cross

    print("KERNEL_OK")
</pallas_src>

<mosaic_0001>
module attributes {stable_mosaic.version = 11 : i64} {
  func.func @angle_embedding_kernel(%arg0: i32, %arg1: memref<72x4xf32, #tpu.memory_space<vmem>>, %arg2: memref<4x64xf32, #tpu.memory_space<vmem>>, %arg3: memref<64x128xf32, #tpu.memory_space<vmem>>, %arg4: memref<64x128xf32, #tpu.memory_space<vmem>>, %arg5: memref<1x128xf32, #tpu.memory_space<vmem>>, %arg6: memref<72x128xf32, #tpu.memory_space<vmem>>) attributes {dimension_semantics = [#tpu.dimension_semantics<parallel>], iteration_bounds = array<i64: 2>, scalar_prefetch = 0 : i64, scratch_operands = 0 : i64, tpu.core_type = #tpu.core_type<tc>, window_params = [{transform_indices = @transform_0, window_bounds = array<i64: 72, 4>}, {pipeline_mode = #tpu.pipeline_mode<synchronous>, transform_indices = @transform_1, window_bounds = array<i64: 4, 64>}, {pipeline_mode = #tpu.pipeline_mode<synchronous>, transform_indices = @transform_2, window_bounds = array<i64: 64, 128>}, {pipeline_mode = #tpu.pipeline_mode<synchronous>, transform_indices = @transform_3, window_bounds = array<i64: 64, 128>}, {pipeline_mode = #tpu.pipeline_mode<synchronous>, transform_indices = @transform_4, window_bounds = array<i64: 1, 128>}, {transform_indices = @transform_5, window_bounds = array<i64: 72, 128>}]} {
    %c0 = arith.constant 0 : index
    %c0_0 = arith.constant 0 : index
    %0 = vector.load %arg1[%c0, %c0_0] : memref<72x4xf32, #tpu.memory_space<vmem>>, vector<72x4xf32>
    %c0_1 = arith.constant 0 : index
    %c0_2 = arith.constant 0 : index
    %1 = vector.load %arg2[%c0_1, %c0_2] : memref<4x64xf32, #tpu.memory_space<vmem>>, vector<4x64xf32>
    %cst = arith.constant dense<0.000000e+00> : vector<72x64xf32>
    %2 = tpu.matmul %0, %1, %cst {dimension_numbers = #tpu.dot_dimension_numbers<[1], [0], [0], [1], [0, 0, 1, 1], [], []>} : vector<72x4xf32>, vector<4x64xf32>, vector<72x64xf32> -> vector<72x64xf32>
    %3 = math.sin %2 : vector<72x64xf32>
    %4 = math.cos %2 : vector<72x64xf32>
    %c0_3 = arith.constant 0 : index
    %c0_4 = arith.constant 0 : index
    %5 = vector.load %arg3[%c0_3, %c0_4] : memref<64x128xf32, #tpu.memory_space<vmem>>, vector<64x128xf32>
    %cst_5 = arith.constant dense<0.000000e+00> : vector<72x128xf32>
    %6 = tpu.matmul %3, %5, %cst_5 {dimension_numbers = #tpu.dot_dimension_numbers<[1], [0], [0], [1], [0, 0, 1, 1], [], []>} : vector<72x64xf32>, vector<64x128xf32>, vector<72x128xf32> -> vector<72x128xf32>
    %c0_6 = arith.constant 0 : index
    %c0_7 = arith.constant 0 : index
    %7 = vector.load %arg4[%c0_6, %c0_7] : memref<64x128xf32, #tpu.memory_space<vmem>>, vector<64x128xf32>
    %cst_8 = arith.constant dense<0.000000e+00> : vector<72x128xf32>
    %8 = tpu.matmul %4, %7, %cst_8 {dimension_numbers = #tpu.dot_dimension_numbers<[1], [0], [0], [1], [0, 0, 1, 1], [], []>} : vector<72x64xf32>, vector<64x128xf32>, vector<72x128xf32> -> vector<72x128xf32>
    %9 = arith.addf %6, %8 : vector<72x128xf32>
    %c0_9 = arith.constant 0 : index
    %c0_10 = arith.constant 0 : index
    %10 = vector.load %arg5[%c0_9, %c0_10] : memref<1x128xf32, #tpu.memory_space<vmem>>, vector<1x128xf32>
    %11 = vector.broadcast %10 : vector<1x128xf32> to vector<72x128xf32>
    %12 = arith.addf %9, %11 : vector<72x128xf32>
    %c0_11 = arith.constant 0 : index
    %c0_12 = arith.constant 0 : index
    %13 = vector.load %arg6[%c0_11, %c0_12] : memref<72x128xf32, #tpu.memory_space<vmem>>, vector<72x128xf32>
    tpu.vector_store %arg6[%c0_11, %c0_12], %12 {strides = array<i32>} : memref<72x128xf32, #tpu.memory_space<vmem>>, vector<72x128xf32>,
    return
  }
  func.func @transform_0(%arg0: i32) -> (i32, i32) {
    %c0_i32 = arith.constant 0 : i32
    %c0_i32_0 = arith.constant 0 : i32
    return %arg0, %c0_i32 : i32, i32
  }
  func.func @transform_1(%arg0: i32) -> (i32, i32) {
    %c0_i32 = arith.constant 0 : i32
    %c0_i32_0 = arith.constant 0 : i32
    %c0_i32_1 = arith.constant 0 : i32
    return %c0_i32, %c0_i32_0 : i32, i32
  }
  func.func @transform_2(%arg0: i32) -> (i32, i32) {
    %c0_i32 = arith.constant 0 : i32
    %c0_i32_0 = arith.constant 0 : i32
    %c0_i32_1 = arith.constant 0 : i32
    return %c0_i32, %c0_i32_0 : i32, i32
  }
  func.func @transform_3(%arg0: i32) -> (i32, i32) {
    %c0_i32 = arith.constant 0 : i32
    %c0_i32_0 = arith.constant 0 : i32
    %c0_i32_1 = arith.constant 0 : i32
    return %c0_i32, %c0_i32_0 : i32, i32
  }
  func.func @transform_4(%arg0: i32) -> (i32, i32) {
    %c0_i32 = arith.constant 0 : i32
    %c0_i32_0 = arith.constant 0 : i32
    %c0_i32_1 = arith.constant 0 : i32
    return %c0_i32, %c0_i32_0 : i32, i32
  }
  func.func @transform_5(%arg0: i32) -> (i32, i32) {
    %c0_i32 = arith.constant 0 : i32
    %c0_i32_0 = arith.constant 0 : i32
    return %arg0, %c0_i32 : i32, i32
  }
}

</mosaic_0001>

<bundles_post_ra>
// kernel: tpu_custom_call.1
= control target key start
LH: loop header
LB: loop body
LE: loop exit
PB: predicated region body
PF: predicated region fallthrough
CT: control target
= control target key end

     0   :  { %10 = vsyncpa [#allocation3], 0  ;;  %s4293_s0 = inlined_call_operand.vmem [shape: f32[136,4], index: 0, kind: input, shape index: {}]   ;;  %s4294_s1 = inlined_call_operand.vmem [shape: f32[4,64], index: 1, kind: input, shape index: {}]   ;;  %s4295_s2 = inlined_call_operand.vmem [shape: f32[64,128], index: 2, kind: input, shape index: {}]   ;;  %s4296_s3 = inlined_call_operand.vmem [shape: f32[64,128], index: 3, kind: input, shape index: {}]   ;;  %s4297_s4 = inlined_call_operand.vmem [shape: f32[1,128], index: 4, kind: input, shape index: {}]   ;;  %s4298_s5 = inlined_call_operand.hbm [shape: f32[136,128], index: 5, kind: output, shape index: {}]  }
   0x1   :  { %12 = vsyncpa [#allocation3 + $0x1], 0  ;;  %s3190_s18 = smov 0   ;;  %s3192_s19 = smov 0  }
   0x2   :  { %s3194_s20 = smov 0   ;;  %s3196_s21 = smov 0  }
   0x3 LB: > { %s3211_s22 = sadd.s32 4294967295, %s3146_s21   ;;  %s2663_s23 = sadd.s32 4294967294, %s3146_s21   ;;  %s3146_s21 = sphi %s3196_s21, %s4347_s21   ;;  %s3142_s20 = sphi %s3194_s20, %s4346_s20   ;;  %s3138_s19 = sphi %s3192_s19, %s4345_s19   ;;  %s3134_s18 = sphi %s3190_s18, %s4344_s18  }
   0x4   : > { %s3215_s24 = sadd.s32 1, %s3146_s21   ;;  %s135_s25 = sadd.s32 1, %s3142_s20 }
   0x5   : > { %s132_s26 = ssub.s32 %s3146_s21, %s3215_s24  ;;  %p145_p0 = scmp.ne.s32.totalorder %s3142_s20, %s3138_s19 }
   0x6   : > { %p133_p1 = scmp.eq.s32.totalorder %s132_s26, 0  ;;  %p146_p2 = scmp.eq.s32.totalorder %s3211_s22, 1 }
   0x7   : > { %p151_p3 = scmp.ne.s32.totalorder %s3138_s19, %s3134_s18  ;;  %p152_p4 = scmp.eq.s32.totalorder %s2663_s23, 1 }
   0x8   : > { %s3226_s27 = scalar_select %p133_p1, %s3142_s20, %s135_s25  }
   0x9   : > { %p3228_p5 = por %p146_p2, %p145_p0  ;;  %p3232_p6 = por %p152_p4, %p151_p3 }
   0xa   : > { %p2666_p7 = scmp.ge.s32.totalorder %s3146_s21, 1  ;;  %p199_p8 = scmp.lt.s32.totalorder %s3146_s21, 3 }
   0xc   : > { %p200_p9 = pnand %p2666_p7, %p199_p8 }
   0xe   : > { %203 = sbr.rel (%p200_p9) target bundleno = 736 (0x2e0), region = 40 }
  0x15   : > { %v259_v0 = vld [vmem:[%s4294_s1] sm:$0xf]  ;;  %vm288_vm0 = vcmask 1043456   ;;  %s3242_s7 = smul.u32 9, %s3211_s22  ;;  %v4299_v1 = vmov 0.0   ;;  %vm3149_vm1 = vmmov 0  }
  0x16   : > { %2821 = vmatprep.subr.mxu0 %v4299_v1  ;;  %2960 = vmatprep.subr.mxu1 %v4299_v1  ;;  %vm260_vm2 = vcmask 31744   ;;  %v3150_v53 = vmov 683565275   ;;  %v3151_v59 = vmov 2475754826   ;;  %s228_s15 = sand.u32 1, %s3138_s19  }
  0x17   : > { %2822 = vmatpush3.msk.msra.mxu0 %vm288_vm0, %v259_v0  ;;  %2961 = vmatpush3.msk.msra.mxu1 %vm288_vm0, %v259_v0  ;;  %p236_p10 = scmp.lt.s32.totalorder %s3242_s7, 16  ;;  %v4304_v61 = vmov 2131351028   ;;  %v4302_v63 = vmov 2102212464   ;;  %s2962_s16 = smul.u32 72, %s228_s15 }
  0x18   : > { %2823 = vmatprep.mubr.msk.f32.mxu0 %vm3149_vm1, %v4299_v1  ;;  %2835 = vmatprep.mubr.msk.f32.mxu1 %vm3149_vm1, %v4299_v1  ;;  %s4232_s26 = scalar_lea.sflag [#allocation3], %s228_s15  ;;  %s2590_s30 = ssub.s32 (%p3228_p5), 17, %s3242_s7 }
  0x19   : > { %s237_s8 = scalar_select %p236_p10, %s3242_s7, 16 }
  0x1a   : > { %s4219_s25 = scalar_lea.vmem [#allocation2], %s2962_s16  ;;  %p2591_p11 = scmp.lt.s32.totalorder (%p3228_p5), %s2590_s30, 9 }
  0x1b   : > { %s2667_s9 = sshll.u32 %s237_s8, 3 }
  0x1c   : > { %s239_s12 = scalar_lea.vmem %s4293_s0, %s2667_s9 }
  0x1d   : > { %v250_v2 = vld [vmem:[%s239_s12] sm:$0xff]  ;;  %v251_v4 = vld [vmem:[%s239_s12 + $0x8] sm:$0xff]  ;;  %v252_v6 = vld [vmem:[%s239_s12 + $0x10] sm:$0xff] }
  0x1e   : > { %v254_v3 = vld [vmem:[%s239_s12 + $0x20] sm:$0xff]  ;;  %2824 = vmatmul.mubr.msk.f32.vlgmr.msra.gmra.mrb[0].mxu0 %vm260_vm2, %v250_v2  ;;  %v255_v5 = vld [vmem:[%s239_s12 + $0x28] sm:$0xff]  ;;  %v256_v7 = vld [vmem:[%s239_s12 + $0x30] sm:$0xff]  ;;  %v3154_v2 = vmov 920167782  }
  0x1f   : > { %2836 = vmatmul.mubr.msk.f32.vlgmr.msra.gmra.mrb[0].mxu1 %vm260_vm2, %v254_v3  ;;  %2826 = vmatprep.mubr.msk.f32.mxu0 %vm3149_vm1, %v4299_v1  ;;  %v253_v8 = vld [vmem:[%s239_s12 + $0x18] sm:$0xff]  ;;  %v258_v10 = vld [vmem:[%s239_s12 + $0x40] sm:$0xff] }
  0x20   : > { %2838 = vmatprep.mubr.msk.f32.mxu1 %vm3149_vm1, %v4299_v1  ;;  %v257_v9 = vld [vmem:[%s239_s12 + $0x38] sm:$0xff] }
  0x22   : > { %2827 = vmatmul.mubr.msk.f32.gmra.mrb[2].mxu0 %vm260_vm2, %v251_v4 }
  0x23   : > { %2839 = vmatmul.mubr.msk.f32.gmra.mrb[2].mxu1 %vm260_vm2, %v255_v5  ;;  %2829 = vmatprep.mubr.msk.f32.mxu0 %vm3149_vm1, %v4299_v1 }
  0x24   : > { %2841 = vmatprep.mubr.msk.f32.mxu1 %vm3149_vm1, %v4299_v1 }
  0x26   : > { %2830 = vmatmul.mubr.msk.f32.gmra.mrb[4].mxu0 %vm260_vm2, %v252_v6 }
  0x27   : > { %2842 = vmatmul.mubr.msk.f32.gmra.mrb[4].mxu1 %vm260_vm2, %v256_v7  ;;  %2832 = vmatprep.mubr.msk.f32.mxu0 %vm3149_vm1, %v4299_v1 }
  0x28   : > { %2844 = vmatprep.mubr.msk.f32.mxu1 %vm3149_vm1, %v4299_v1 }
  0x2a   : > { %2833 = vmatmul.mubr.msk.f32.gmra.mrb[6].mxu0 %vm260_vm2, %v253_v8 }
  0x2b   : > { %2845 = vmatmul.mubr.msk.f32.gmra.mrb[6].mxu1 %vm260_vm2, %v257_v9  ;;  %2909 = vmatprep.mubr.msk.f32.mxu0 %vm3149_vm1, %v4299_v1  ;;  %v4306_v9 = vmov 1326507024  }
  0x2c   : > { %2847 = vmatprep.mubr.msk.f32.mxu1 %vm3149_vm1, %v4299_v1 }
  0x2f   : > { %2848 = vmatmul.mubr.msk.f32.gmra.mrb[8].mxu1 %vm260_vm2, %v258_v10 }
  0x30   : > { %2866 = vmatprep.mubr.msk.f32.mxu1 %vm3149_vm1, %v4299_v1 }
  0xf1   : > { %v3282_v11 = vpop.f32.mrb[0].mxu0 }
  0xf2   : > { %v3284_v12 = vpop.f32.mrb[0].mxu1  ;;  %v402_v13 = vand.u32 2147483647, %v3282_v11  ;;  %v405_v14 = vand.u32 2139095040, %v3282_v11  ;;  %v2825_v15 = vpop.f32.mrb[1].mxu0  ;;  %vm404_vm0 = vcmp.lt.s32.totalorder %v3282_v11, 0 }
  0xf3   : > { %v2837_v16 = vpop.f32.mrb[1].mxu1  ;;  %v818_v17 = vand.u32 2147483647, %v3284_v12  ;;  %v821_v18 = vand.u32 2139095040, %v3284_v12 }
  0xf4   : > { %v406_v19 = vshrl.u32 %v405_v14, 23  ;;  %v409_v20 = vand.u32 8388607, %v402_v13  ;;  %vm3413_vm2 = vcmp.le.f32.partialorder %v402_v13, 0.7853982 }
  0xf5   : > { %v822_v21 = vshrl.u32 %v821_v18, 23  ;;  %v825_v22 = vand.u32 8388607, %v818_v17  ;;  %v3294_v23 = vpop.f32.mrb[2].mxu0 }
  0xf6   : > { %v2678_v24 = vadd.s32 4294967169, %v406_v19  ;;  %v3296_v25 = vpop.f32.mrb[2].mxu1  ;;  %v509_v27 = vand.u32 2139095040, %v3294_v23  ;;  %v2828_v28 = vpop.f32.mrb[3].mxu0  ;;  %v410_v29 = vor.u32 8388608, %v409_v20 }
  0xf7   : > { %v2694_v26 = vadd.s32 4294967169, %v822_v21  ;;  %v826_v31 = vor.u32 8388608, %v825_v22  ;;  %v506_v33 = vand.u32 2147483647, %v3294_v23  ;;  %v2840_v35 = vpop.f32.mrb[3].mxu1 }
  0xf8   : > { %v412_v30 = vadd.s32 1, %v2678_v24  ;;  %v510_v34 = vshrl.u32 %v509_v27, 23  ;;  %v922_v40 = vand.u32 2147483647, %v3296_v25  ;;  %v3305_v44 = vshll.u32 %v410_v29, 8 }
  0xf9   : > { %v828_v32 = vadd.s32 1, %v2694_v26  ;;  %v3300_v36 = vpop.f32.mrb[4].mxu0  ;;  %v3309_v48 = vshll.u32 %v826_v31, 8  ;;  %v3313_v49 = vand.u32 8388607, %v506_v33 }
  0xfa   : > { %vm413_vm3 = vcmp.gt.s32.totalorder %v412_v30, 0  ;;  %v3302_v37 = vpop.f32.mrb[4].mxu1  ;;  %v2682_v39 = vadd.s32 4294967169, %v510_v34  ;;  %v2831_v41 = vpop.f32.mrb[5].mxu0 }
  0xfb   : > { %4314 = vst [vmem:[#allocation5_spill] sm:$0xff] %v3302_v37  ;;  %v414_v38 = vsel %vm413_vm3, %v412_v30, 0  ;;  %vm829_vm4 = vcmp.gt.s32.totalorder %v828_v32, 0  ;;  %v2843_v46 = vpop.f32.mrb[5].mxu1 }
  0xfc   : > { %v415_v42 = vshrl.u32 %v414_v38, 5  ;;  %v416_v43 = vand.u32 31, %v414_v38  ;;  %v830_v45 = vsel %vm829_vm4, %v828_v32, 0  ;;  %v3320_v56 = vadd.s32 1, %v2682_v39 }
  0xfd   : > { %v3307_v47 = vshrl.u32 %v830_v45, 5  ;;  %v3315_v50 = vpop.f32.mrb[6].mxu0  ;;  %v832_v55 = vand.u32 31, %v830_v45 }
  0xfe   : > { %v3317_v51 = vpop.f32.mrb[6].mxu1  ;;  %v417_v52 = vsub.s32 32, %v416_v43  ;;  %v419_v54 = vshll.u32 %v3150_v53, %v416_v43  ;;  %v2834_v57 = vpop.f32.mrb[7].mxu0  ;;  %v422_v60 = vshll.u32 %v3151_v59, %v416_v43  ;;  %v425_v62 = vshll.u32 %v4304_v61, %v416_v43 }
  0xff   : > { %v2846_v58 = vpop.f32.mrb[7].mxu1  ;;  %v428_v0 = vshll.u32 %v4302_v63, %v416_v43  ;;  %v431_v3 = vshll.u32 %v3154_v2, %v416_v43  ;;  %vm434_vm5 = vcmp.lt.s32.totalorder %v415_v42, 1  ;;  %vm436_vm6 = vcmp.lt.s32.totalorder %v415_v42, 3 }
 0x100   : > { %v420_v4 = vshrl.u32 %v3151_v59, %v417_v52  ;;  %v423_v5 = vshrl.u32 %v4304_v61, %v417_v52  ;;  %v426_v6 = vshrl.u32 %v4302_v63, %v417_v52  ;;  %v418_v7 = vshrl.u32 %v3150_v53, %v417_v52 }
 0x101   : > { %v429_v8 = vshrl.u32 %v3154_v2, %v417_v52  ;;  %v432_v10 = vshrl.u32 %v4306_v9, %v417_v52  ;;  %v833_v19 = vsub.s32 32, %v832_v55  ;;  %vm437_vm7 = vcmp.lt.s32.totalorder %v415_v42, 4 }
 0x102   : > { %v3332_v14 = vpop.f32.mrb[8].mxu1  ;;  %v421_v15 = vor.u32 %v420_v4, %v419_v54  ;;  %v424_v16 = vor.u32 %v423_v5, %v422_v60  ;;  %v427_v18 = vor.u32 %v426_v6, %v425_v62  ;;  %v835_v24 = vshll.u32 %v3150_v53, %v832_v55 }
 0x103   : > { %v2849_v20 = vpop.f32.mrb[9].mxu1  ;;  %v430_v21 = vor.u32 %v429_v8, %v428_v0  ;;  %v433_v22 = vor.u32 %v432_v10, %v431_v3  ;;  %v838_v34 = vshll.u32 %v3151_v59, %v832_v55  ;;  %vm435_vm8 = vcmp.lt.s32.totalorder %v415_v42, 2 }
 0x104   : > { %v438_v26 = vsel %vm434_vm5, %v418_v7, %v421_v15  ;;  %v439_v27 = vsel %vm437_vm7, %v427_v18, 2102212464  ;;  %v442_v28 = vsel %vm434_vm5, %v421_v15, %v424_v16  ;;  %v446_v29 = vsel %vm434_vm5, %v424_v16, %v427_v18 }
 0x105   : > { %v440_v30 = vsel %vm436_vm6, %v424_v16, %v439_v27  ;;  %v443_v31 = vsel %vm437_vm7, %v430_v21, 920167782  ;;  %v447_v32 = vsel %vm437_vm7, %v433_v22, 1326507024  ;;  %v836_v39 = vshrl.u32 %v3151_v59, %v833_v19 }
 0x106   : > { %v444_v35 = vsel %vm436_vm6, %v427_v18, %v443_v31  ;;  %v448_v38 = vsel %vm436_vm6, %v430_v21, %v447_v32  ;;  %v441_v41 = vsel %vm435_vm8, %v438_v26, %v440_v30  ;;  %v839_v46 = vshrl.u32 %v4304_v61, %v833_v19 }
 0x107   : > { %v445_v43 = vsel %vm435_vm8, %v442_v28, %v444_v35  ;;  %v449_v45 = vsel %vm435_vm8, %v446_v29, %v448_v38  ;;  %v837_v60 = vor.u32 %v836_v39, %v835_v24  ;;  %v841_v42 = vshll.u32 %v4304_v61, %v832_v55 }
 0x108   : > { %v3345_v52 = vmul.u32.u64.low %v3305_v44, %v449_v45  ;;  %v3346_v54 = vmul.u32.u64.high %v3305_v44, %v449_v45, %v3345_v52  ;;  %v3349_v57 = vmul.u32.u64.low %v3305_v44, %v445_v43  ;;  %v3350_v58 = vmul.u32.u64.high %v3305_v44, %v445_v43, %v3349_v57 }
 0x109   : > { %v840_v62 = vor.u32 %v839_v46, %v838_v34  ;;  %v842_v0 = vshrl.u32 %v4302_v63, %v833_v19  ;;  %v844_v3 = vshll.u32 %v4302_v63, %v832_v55  ;;  %v845_v4 = vshrl.u32 %v3154_v2, %v833_v19 }
 0x10a   : > { %v847_v5 = vshll.u32 %v3154_v2, %v832_v55  ;;  %v848_v6 = vshrl.u32 %v4306_v9, %v833_v19  ;;  %v457_v7 = vmul.u32 %v3305_v44, %v441_v41  ;;  %v834_v8 = vshrl.u32 %v3150_v53, %v833_v19 }
 0x10b   : > { %v843_v10 = vor.u32 %v842_v0, %v841_v42  ;;  %vm850_vm9 = vcmp.lt.s32.totalorder %v3307_v47, 1  ;;  %vm459_vm10 = vc.u32 %v3346_v54, %v3349_v57  ;;  %v460_v15 = vadd.s32 1, %v3350_v58 }
 0x10c   : > { %v846_v16 = vor.u32 %v845_v4, %v844_v3  ;;  %vm852_vm11 = vcmp.lt.s32.totalorder %v3307_v47, 3  ;;  %v849_v18 = vor.u32 %v848_v6, %v847_v5  ;;  %vm851_vm12 = vcmp.lt.s32.totalorder %v3307_v47, 2 }
 0x10d   : > { %vm853_vm13 = vcmp.lt.s32.totalorder %v3307_v47, 4  ;;  %v858_v55 = vsel %vm850_vm9, %v837_v60, %v840_v62  ;;  %v461_v44 = vsel %vm459_vm10, %v460_v15, %v3350_v58  ;;  %v862_v21 = vsel %vm850_vm9, %v840_v62, %v843_v10 }
 0x10e   : > { %v855_v20 = vsel %vm853_vm13, %v843_v10, 2102212464  ;;  %v859_v19 = vsel %vm853_vm13, %v846_v16, 920167782  ;;  %v462_v22 = vadd.s32 %v461_v44, %v457_v7  ;;  %v854_v24 = vsel %vm850_vm9, %v834_v8, %v837_v60 }
 0x10f   : > { %v860_v26 = vsel %vm852_vm11, %v843_v10, %v859_v19  ;;  %v863_v27 = vsel %vm853_vm13, %v849_v18, 1326507024  ;;  %v856_v28 = vsel %vm852_vm11, %v840_v62, %v855_v20  ;;  %vm517_vm14 = vcmp.gt.s32.totalorder %v3320_v56, 0 }
 0x110   : > { %v861_v29 = vsel %vm851_vm12, %v858_v55, %v860_v26  ;;  %v864_v30 = vsel %vm852_vm11, %v846_v16, %v863_v27  ;;  %v463_v31 = vadd.s32 536870912, %v462_v22  ;;  %v514_v41 = vor.u32 8388608, %v3313_v49 }
 0x111   : > { %v865_v32 = vsel %vm851_vm12, %v862_v21, %v864_v30  ;;  %v3373_v34 = vmul.u32.u64.low %v3309_v48, %v861_v29  ;;  %v3374_v35 = vmul.u32.u64.high %v3309_v48, %v861_v29, %v3373_v34  ;;  %v518_v43 = vsel %vm517_vm14, %v3320_v56, 0 }
 0x112   : > { %v3378_v38 = vmul.u32.u64.low %v3309_v48, %v865_v32  ;;  %v3379_v39 = vmul.u32.u64.high %v3309_v48, %v865_v32, %v3378_v38  ;;  %v464_v45 = vshrl.u32 %v463_v31, 30  ;;  %v857_v46 = vsel %vm851_vm12, %v854_v24, %v856_v28 }
 0x113   : > { %v520_v52 = vand.u32 31, %v518_v43  ;;  %v925_v58 = vand.u32 2139095040, %v3296_v25  ;;  %v876_v62 = vadd.s32 1, %v3374_v35  ;;  %v873_v0 = vmul.u32 %v3309_v48, %v857_v46 }
 0x114   : > { %v465_v60 = vshll.u32 %v464_v45, 30  ;;  %vm875_vm15 = vc.u32 %v3379_v39, %v3373_v34  ;;  %v3392_v49 = vand.u32 8388607, %v922_v40  ;;  %v3397_v3 = vshll.u32 %v514_v41, 8 }
 0x115   : > { %v521_v42 = vsub.s32 32, %v520_v52  ;;  %v877_v47 = vsel %vm875_vm15, %v876_v62, %v3374_v35  ;;  %v926_v4 = vshrl.u32 %v925_v58, 23  ;;  %v523_v6 = vshll.u32 %v3150_v53, %v520_v52 }
 0x116   : > { %v3394_v56 = vsub.s32 %v462_v22, %v465_v60  ;;  %v878_v5 = vadd.s32 %v877_v47, %v873_v0  ;;  %v458_v8 = vadd.s32 %v3349_v57, %v3346_v54  ;;  %v519_v15 = vshrl.u32 %v518_v43, 5 }
 0x117   : > { %v524_v48 = vshrl.u32 %v3151_v59, %v521_v42  ;;  %v527_v7 = vshrl.u32 %v4304_v61, %v521_v42  ;;  %v526_v16 = vshll.u32 %v3151_v59, %v520_v52  ;;  %v529_v44 = vshll.u32 %v4304_v61, %v520_v52 }
 0x118   : > { %v468_v10 = vsub.s32 0, %v3394_v56  ;;  %v879_v18 = vadd.s32 536870912, %v878_v5  ;;  %v530_v20 = vshrl.u32 %v4302_v63, %v521_v42  ;;  %v532_v22 = vshll.u32 %v4302_v63, %v520_v52 }
 0x119   : > { %v525_v55 = vor.u32 %v524_v48, %v523_v6  ;;  %v528_v21 = vor.u32 %v527_v7, %v526_v16  ;;  %v533_v24 = vshrl.u32 %v3154_v2, %v521_v42  ;;  %v536_v27 = vshrl.u32 %v4306_v9, %v521_v42 }
 0x11a   : > { %v2679_v19 = vmin.u32 %v468_v10, %v3394_v56  ;;  %v3417_v57 = vshrl.u32 %v879_v18, 30  ;;  %v531_v26 = vor.u32 %v530_v20, %v529_v44  ;;  %v2698_v28 = vadd.s32 4294967169, %v926_v4 }
 0x11b   : > { %v488_v30 = vsub.s32 4, %v464_v45  ;;  %v534_v31 = vor.u32 %v533_v24, %v532_v22  ;;  %v535_v32 = vshll.u32 %v3154_v2, %v520_v52  ;;  %v522_v38 = vshrl.u32 %v3150_v53, %v521_v42 }
 0x11c   : > { %v470_v29 = vclz %v2679_v19  ;;  %v881_v35 = vshll.u32 %v3417_v57, 30  ;;  %vm538_vm3 = vcmp.lt.s32.totalorder %v519_v15, 1  ;;  %v930_v13 = vor.u32 8388608, %v3392_v49 }
 0x11d   : > { %v537_v43 = vor.u32 %v536_v27, %v535_v32  ;;  %vm541_vm4 = vcmp.lt.s32.totalorder %v519_v15, 4  ;;  %v546_v46 = vsel %vm538_vm3, %v525_v55, %v528_v21  ;;  %vm540_vm5 = vcmp.lt.s32.totalorder %v519_v15, 3 }
 0x11e   : > { %v2680_v41 = vadd.s32 4294967294, %v470_v29  ;;  %v3425_v58 = vsub.s32 %v878_v5, %v881_v35  ;;  %v543_v60 = vsel %vm541_vm4, %v531_v26, 2102212464  ;;  %v547_v62 = vsel %vm541_vm4, %v534_v31, 920167782 }
 0x11f   : > { %v489_v52 = vsel %vm404_vm0, %v488_v30, %v464_v45  ;;  %vm539_vm7 = vcmp.lt.s32.totalorder %v519_v15, 2  ;;  %v548_v42 = vsel %vm540_vm5, %v531_v26, %v547_v62  ;;  %v542_v4 = vsel %vm538_vm3, %v522_v38, %v525_v55 }
 0x120   : > { %vm2681_vm6 = vcmp.lt.s32.totalorder %v2680_v41, 0  ;;  %v884_v47 = vsub.s32 0, %v3425_v58  ;;  %v549_v5 = vsel %vm539_vm7, %v546_v46, %v548_v42  ;;  %v544_v7 = vsel %vm540_vm5, %v528_v21, %v543_v60 }
 0x121   : > { %v473_v0 = vsel %vm2681_vm6, 0, %v2680_v41  ;;  %v550_v10 = vsel %vm538_vm3, %v528_v21, %v531_v26  ;;  %v551_v45 = vsel %vm541_vm4, %v537_v43, 1326507024  ;;  %v491_v55 = vsel %vm3413_vm2, 0, %v489_v52 }
 0x122   : > { %v474_v6 = vsub.s32 32, %v473_v0  ;;  %v478_v48 = vsub.s32 4294967266, %v473_v0  ;;  %v2695_v16 = vmin.u32 %v884_v47, %v3425_v58  ;;  %v552_v22 = vsel %vm540_vm5, %v534_v31, %v551_v45 }
 0x123   : > { %v3440_v18 = vmul.u32.u64.low %v3397_v3, %v549_v5  ;;  %v3441_v44 = vmul.u32.u64.high %v3397_v3, %v549_v5, %v3440_v18  ;;  %v475_v24 = vshll.u32 %v3394_v56, %v473_v0  ;;  %v553_v21 = vsel %vm539_vm7, %v550_v10, %v552_v22 }
 0x124   : > { %v476_v20 = vshrl.u32 %v458_v8, %v474_v6  ;;  %v479_v19 = vadd.s32 127, %v478_v48  ;;  %v886_v27 = vclz %v2695_v16  ;;  %v932_v26 = vadd.s32 1, %v2698_v28 }
 0x125   : > { %v545_v30 = vsel %vm539_vm7, %v542_v4, %v544_v7  ;;  %v3451_v32 = vmul.u32.u64.low %v3397_v3, %v553_v21  ;;  %v3452_v35 = vmul.u32.u64.high %v3397_v3, %v553_v21, %v3451_v32  ;;  %v564_v41 = vadd.s32 1, %v3441_v44 }
 0x126   : > { %v480_v29 = vshll.u32 %v479_v19, 23  ;;  %v477_v8 = vor.u32 %v476_v20, %v475_v24  ;;  %v2696_v38 = vadd.s32 4294967294, %v886_v27  ;;  %vm933_vm8 = vcmp.gt.s32.totalorder %v932_v26, 0 }
 0x127   : > { %vm820_vm9 = vcmp.lt.s32.totalorder %v3284_v12, 0  ;;  %v934_v56 = vsel %vm933_vm8, %v932_v26, 0  ;;  %v610_v31 = vand.u32 2147483647, %v3300_v36  ;;  %v613_v28 = vand.u32 2139095040, %v3300_v36 }
 0x128   : > { %v481_v43 = vor.u32 4788187, %v480_v29  ;;  %v495_v46 = vadd.s32 3, %v491_v55  ;;  %v874_v15 = vadd.s32 %v3373_v34, %v3379_v39  ;;  %vm2697_vm10 = vcmp.lt.s32.totalorder %v2696_v38, 0 }
 0x129   : > { %v936_v60 = vand.u32 31, %v934_v56  ;;  %v889_v52 = vsel %vm2697_vm10, 0, %v2696_v38  ;;  %v561_v42 = vmul.u32 %v3397_v3, %v545_v30  ;;  %vm563_vm11 = vc.u32 %v3452_v35, %v3440_v18 }
 0x12a   : > { %v482_v62 = vand.u32 2147483647, %v481_v43  ;;  %v484_v0 = vcvt.s32.f32 %v477_v8  ;;  %v890_v47 = vsub.s32 32, %v889_v52  ;;  %v894_v4 = vsub.s32 4294967266, %v889_v52 }
 0x12b   : > { %v565_v5 = vsel %vm563_vm11, %v564_v41, %v3441_v44  ;;  %v3464_v6 = vand.u32 3, %v491_v55  ;;  %v904_v48 = vsub.s32 4, %v3417_v57  ;;  %v937_v34 = vsub.s32 32, %v936_v60 }
 0x12c   : > { %v566_v7 = vadd.s32 %v565_v5, %v561_v42  ;;  %v485_v39 = vmul.f32 %v484_v0, %v482_v62  ;;  %v891_v10 = vshll.u32 %v3425_v58, %v889_v52  ;;  %v892_v16 = vshrl.u32 %v874_v15, %v890_v47 }
 0x12d   : > { %v895_v45 = vadd.s32 127, %v894_v4  ;;  %v3468_v3 = vand.u32 3, %v495_v46  ;;  %v939_v19 = vshll.u32 %v3150_v53, %v936_v60  ;;  %v940_v22 = vshrl.u32 %v3151_v59, %v937_v34 }
 0x12e   : > { %v567_v20 = vadd.s32 536870912, %v566_v7  ;;  %v893_v24 = vor.u32 %v892_v16, %v891_v10  ;;  %v942_v55 = vshll.u32 %v3151_v59, %v936_v60  ;;  %v943_v27 = vshrl.u32 %v4304_v61, %v937_v34 }
 0x12f   : > { %v896_v44 = vshll.u32 %v895_v45, 23  ;;  %v935_v26 = vshrl.u32 %v934_v56, 5  ;;  %v945_v58 = vshll.u32 %v4304_v61, %v936_v60  ;;  %v946_v29 = vshrl.u32 %v4302_v63, %v937_v34 }
 0x130   : > { %v3474_v21 = vshrl.u32 %v567_v20, 30  ;;  %v486_v30 = vxor.u32 2147483648, %v485_v39  ;;  %v905_v8 = vsel %vm820_vm9, %v904_v48, %v3417_v57  ;;  %v948_v38 = vshll.u32 %v4302_v63, %v936_v60 }
 0x131   : > { %v897_v32 = vor.u32 4788187, %v896_v44  ;;  %v900_v41 = vcvt.s32.f32 %v893_v24  ;;  %v941_v46 = vor.u32 %v940_v22, %v939_v19  ;;  %v3485_v15 = vshll.u32 %v930_v13, 8 }
 0x132   : > { %v569_v43 = vshll.u32 %v3474_v21, 30  ;;  %vm3489_vm12 = vcmp.le.f32.partialorder %v818_v17, 0.7853982  ;;  %v944_v52 = vor.u32 %v943_v27, %v942_v55  ;;  %v949_v57 = vshrl.u32 %v3154_v2, %v937_v34 }
 0x133   : > { %v898_v62 = vand.u32 2147483647, %v897_v32  ;;  %v951_v42 = vshll.u32 %v3154_v2, %v936_v60  ;;  %v947_v47 = vor.u32 %v946_v29, %v945_v58  ;;  %v952_v4 = vshrl.u32 %v4306_v9, %v937_v34 }
 0x134   : > { %v3495_v0 = vsub.s32 %v566_v7, %v569_v43  ;;  %vm954_vm13 = vcmp.lt.s32.totalorder %v935_v26, 1  ;;  %v487_v49 = vsel %vm404_vm0, %v486_v30, %v485_v39  ;;  %v938_v17 = vshrl.u32 %v3150_v53, %v937_v34 }
 0x135   : > { %v901_v13 = vmul.f32 %v900_v41, %v898_v62  ;;  %v950_v5 = vor.u32 %v949_v57, %v948_v38  ;;  %vm508_vm14 = vcmp.lt.s32.totalorder %v3294_v23, 0  ;;  %v953_v10 = vor.u32 %v952_v4, %v951_v42 }
 0x136   : > { %v572_v48 = vsub.s32 0, %v3495_v0  ;;  %vm956_vm15 = vcmp.lt.s32.totalorder %v935_v26, 3  ;;  %vm957_vm3 = vcmp.lt.s32.totalorder %v935_v26, 4  ;;  %vm955_vm4 = vcmp.lt.s32.totalorder %v935_v26, 2 }
 0x137   : > { %v959_v60 = vsel %vm957_vm3, %v947_v47, 2102212464  ;;  %v962_v7 = vsel %vm954_vm13, %v941_v46, %v944_v52  ;;  %v614_v16 = vshrl.u32 %v613_v28, 23  ;;  %v490_v39 = vsel %vm3413_vm2, %v3282_v11, %v487_v49 }
 0x138   : > { %v2683_v34 = vmin.u32 %v572_v48, %v3495_v0  ;;  %v963_v45 = vsel %vm957_vm3, %v950_v5, 920167782  ;;  %v966_v20 = vsel %vm954_vm13, %v944_v52, %v947_v47  ;;  %v902_v19 = vxor.u32 2147483648, %v901_v13 }
 0x139   : > { %v958_v22 = vsel %vm954_vm13, %v938_v17, %v941_v46  ;;  %v964_v24 = vsel %vm956_vm15, %v947_v47, %v963_v45  ;;  %v967_v44 = vsel %vm957_vm3, %v953_v10, 1326507024  ;;  %vm3515_vm0 = vcmp.le.f32.partialorder %v506_v33, 0.7853982 }
 0x13a   : > { %v574_v28 = vclz %v2683_v34  ;;  %v960_v54 = vsel %vm956_vm15, %v944_v52, %v959_v60  ;;  %v965_v27 = vsel %vm955_vm4, %v962_v7, %v964_v24  ;;  %v968_v58 = vsel %vm956_vm15, %v950_v5, %v967_v44 }
 0x13b   : > { %v592_v29 = vsub.s32 4, %v3474_v21  ;;  %v969_v30 = vsel %vm955_vm4, %v966_v20, %v968_v58  ;;  %v3525_v32 = vmul.u32.u64.low %v3485_v15, %v965_v27  ;;  %v3526_v38 = vmul.u32.u64.high %v3485_v15, %v965_v27, %v3525_v32 }
 0x13c   : > { %v3531_v33 = vsel %vm3489_vm12, 0, %v905_v8  ;;  %v2684_v41 = vadd.s32 4294967294, %v574_v28  ;;  %v3534_v43 = vmul.u32.u64.low %v3485_v15, %v969_v30  ;;  %v3535_v46 = vmul.u32.u64.high %v3485_v15, %v969_v30, %v3534_v43 }
 0x13d   : > { %3048 = vcosq.f32 %v490_v39  ;;  %v903_v62 = vsel %vm820_vm9, %v902_v19, %v901_v13  ;;  %v961_v52 = vsel %vm955_vm4, %v958_v22, %v960_v54  ;;  %v2686_v57 = vadd.s32 4294967169, %v614_v16 }
 0x13e   : > { %3050 = vsinq.f32 %v490_v39  ;;  %v562_v42 = vadd.s32 %v3440_v18, %v3452_v35  ;;  %vm2685_vm2 = vcmp.lt.s32.totalorder %v2684_v41, 0  ;;  %v617_v8 = vand.u32 8388607, %v610_v31 }
 0x13f   : > { %v577_v47 = vsel %vm2685_vm2, 0, %v2684_v41  ;;  %v593_v4 = vsel %vm508_vm14, %v592_v29, %v3474_v21  ;;  %v980_v49 = vadd.s32 1, %v3526_v38  ;;  %v620_v17 = vadd.s32 1, %v2686_v57 }
 0x140   : > { %v3551_v26 = vsel %vm3489_vm12, %v3284_v12, %v903_v62  ;;  %v578_v13 = vsub.s32 32, %v577_v47  ;;  %v582_v5 = vsub.s32 4294967266, %v577_v47  ;;  %v977_v18 = vmul.u32 %v3485_v15, %v961_v52 }
 0x141   : > { %v579_v35 = vshll.u32 %v3495_v0, %v577_v47  ;;  %vm979_vm5 = vc.u32 %v3535_v46, %v3525_v32  ;;  %vm621_vm6 = vcmp.gt.s32.totalorder %v620_v17, 0  ;;  %v1029_v21 = vand.u32 2139095040, %v3302_v37 }
 0x142   : > { %v580_v48 = vshrl.u32 %v562_v42, %v578_v13  ;;  %v583_v10 = vadd.s32 127, %v582_v5  ;;  %v981_v60 = vsel %vm979_vm5, %v980_v49, %v3526_v38  ;;  %v622_v7 = vsel %vm621_vm6, %v620_v17, 0 }
 0x143   : > { %3052 = vcosq.f32 %v3551_v26  ;;  %v3562_v56 = vsel %vm3515_vm0, 0, %v593_v4  ;;  %v982_v15 = vadd.s32 %v981_v60, %v977_v18  ;;  %v624_v16 = vand.u32 31, %v622_v7 }
 0x144   : > { %v581_v0 = vor.u32 %v580_v48, %v579_v35  ;;  %v584_v39 = vshll.u32 %v583_v10, 23  ;;  %v618_v34 = vor.u32 8388608, %v617_v8  ;;  %v1026_v45 = vand.u32 2147483647, %v3302_v37 }
 0x145   : > { %v983_v20 = vadd.s32 536870912, %v982_v15  ;;  %v3565_v19 = vshrl.u32 %v622_v7, 5  ;;  %v625_v22 = vsub.s32 32, %v624_v16  ;;  %v1030_v24 = vshrl.u32 %v1029_v21, 23 }
 0x146   : > { %v585_v44 = vor.u32 4788187, %v584_v39  ;;  %v588_v28 = vcvt.s32.f32 %v581_v0  ;;  %v627_v54 = vshll.u32 %v3150_v53, %v624_v16  ;;  %v630_v27 = vshll.u32 %v3151_v59, %v624_v16 }
 0x147   : > { %v3569_v58 = vpop.eup %3048  ;;  %vm924_vm7 = vcmp.lt.s32.totalorder %v3296_v25, 0  ;;  %v984_v29 = vshrl.u32 %v983_v20, 30  ;;  %v628_v30 = vshrl.u32 %v3151_v59, %v625_v22  ;;  %v631_v38 = vshrl.u32 %v4304_v61, %v625_v22 }
 0x148   : > { %v633_v41 = vshll.u32 %v4304_v61, %v624_v16  ;;  %v3575_v43 = vpop.eup %3050  ;;  %v586_v62 = vand.u32 2147483647, %v585_v44  ;;  %v634_v52 = vshrl.u32 %v4302_v63, %v625_v22  ;;  %v636_v57 = vshll.u32 %v4302_v63, %v624_v16 }
 0x149   : > { %v637_v42 = vshrl.u32 %v3154_v2, %v625_v22  ;;  %v985_v8 = vshll.u32 %v984_v29, 30  ;;  %v629_v47 = vor.u32 %v628_v30, %v627_v54  ;;  %v632_v4 = vor.u32 %v631_v38, %v630_v27 }
 0x14a   : > { %v639_v49 = vshll.u32 %v3154_v2, %v624_v16  ;;  %v589_v17 = vmul.f32 %v588_v28, %v586_v62  ;;  %v635_v13 = vor.u32 %v634_v52, %v633_v41  ;;  %v640_v18 = vshrl.u32 %v4306_v9, %v625_v22 }
 0x14b   : > { %v638_v5 = vor.u32 %v637_v42, %v636_v57  ;;  %v3582_v35 = vsub.s32 %v982_v15, %v985_v8  ;;  %v658_v21 = vshll.u32 %v618_v34, 8  ;;  %v2702_v48 = vadd.s32 4294967169, %v1030_v24 }
 0x14c   : > { %v1033_v10 = vand.u32 8388607, %v1026_v45  ;;  %v590_v60 = vxor.u32 2147483648, %v589_v17  ;;  %vm3588_vm8 = vcmp.le.f32.partialorder %v922_v40, 0.7853982  ;;  %v1008_v16 = vsub.s32 4, %v984_v29 }
 0x14d   : > { %v641_v0 = vor.u32 %v640_v18, %v639_v49  ;;  %vm642_vm9 = vcmp.lt.s32.totalorder %v3565_v19, 1  ;;  %v3593_v39 = vpop.eup %3052  ;;  %v988_v15 = vsub.s32 0, %v3582_v35  ;;  %v626_v34 = vshrl.u32 %v3150_v53, %v625_v22 }
 0x14e   : > { %vm645_vm10 = vcmp.lt.s32.totalorder %v3565_v19, 4  ;;  %v650_v20 = vsel %vm642_vm9, %v629_v47, %v632_v4  ;;  %v591_v24 = vsel %vm508_vm14, %v590_v60, %v589_v17  ;;  %vm644_vm11 = vcmp.lt.s32.totalorder %v3565_v19, 3 }
 0x14f   : > { %v647_v40 = vsel %vm645_vm10, %v635_v13, 2102212464  ;;  %v651_v44 = vsel %vm645_vm10, %v638_v5, 920167782  ;;  %v2699_v28 = vmin.u32 %v988_v15, %v3582_v35  ;;  %vm643_vm12 = vcmp.lt.s32.totalorder %v3565_v19, 2 }
 0x150   : > { %v652_v54 = vsel %vm644_vm11, %v635_v13, %v651_v44  ;;  %v654_v27 = vsel %vm642_vm9, %v632_v4, %v635_v13  ;;  %v1009_v30 = vsel %vm924_vm7, %v1008_v16, %v984_v29  ;;  %v646_v22 = vsel %vm642_vm9, %v626_v34, %v629_v47 }
 0x151   : > { %v653_v38 = vsel %vm643_vm12, %v650_v20, %v652_v54  ;;  %v655_v41 = vsel %vm645_vm10, %v641_v0, 1326507024  ;;  %v3610_v62 = vsel %vm3515_vm0, %v3294_v23, %v591_v24  ;;  %v990_v52 = vclz %v2699_v28 }
 0x152   : > { %v648_v57 = vsel %vm644_vm11, %v632_v4, %v647_v40  ;;  %v656_v42 = vsel %vm644_vm11, %v638_v5, %v655_v41  ;;  %v3614_v49 = vmul.u32.u64.low %v658_v21, %v653_v38  ;;  %v3615_v17 = vmul.u32.u64.high %v658_v21, %v653_v38, %v3614_v49 }
 0x153   : > { %v657_v8 = vsel %vm643_vm12, %v654_v27, %v656_v42  ;;  %v1034_v29 = vor.u32 8388608, %v1033_v10  ;;  %v2700_v47 = vadd.s32 4294967294, %v990_v52  ;;  %v1036_v60 = vadd.s32 1, %v2702_v48 }
 0x154   : > { %v3618_v13 = vmul.u32.u64.low %v658_v21, %v657_v8  ;;  %v3619_v18 = vmul.u32.u64.high %v658_v21, %v657_v8, %v3618_v13  ;;  %3054 = vsinq.f32 %v3551_v26  ;;  %v649_v55 = vsel %vm643_vm12, %v646_v22, %v648_v57 }
 0x155   : > { %v714_v4 = vand.u32 2147483647, %v3315_v50  ;;  %v717_v5 = vand.u32 2139095040, %v3315_v50  ;;  %v978_v16 = vadd.s32 %v3525_v32, %v3535_v46  ;;  %vm2701_vm13 = vcmp.lt.s32.totalorder %v2700_v47, 0 }
 0x156   : > { %v3630_v10 = vsel %vm3588_vm8, 0, %v1009_v30  ;;  %vm1037_vm14 = vcmp.gt.s32.totalorder %v1036_v60, 0  ;;  %3056 = vcosq.f32 %v3610_v62  ;;  %v993_v48 = vsel %vm2701_vm13, 0, %v2700_v47 }
 0x157   : > { %v668_v26 = vadd.s32 1, %v3615_v17  ;;  %v1038_v19 = vsel %vm1037_vm14, %v1036_v60, 0  ;;  %v994_v0 = vsub.s32 32, %v993_v48  ;;  %v998_v15 = vsub.s32 4294967266, %v993_v48 }
 0x158   : > { %v665_v34 = vmul.u32 %v658_v21, %v649_v55  ;;  %v3634_v20 = vshll.u32 %v1034_v29, 8  ;;  %vm667_vm15 = vc.u32 %v3619_v18, %v3614_v49  ;;  %v1040_v32 = vand.u32 31, %v1038_v19 }
 0x159   : > { %v718_v46 = vshrl.u32 %v717_v5, 23  ;;  %v3640_v24 = vand.u32 8388607, %v714_v4  ;;  %v995_v40 = vshll.u32 %v3582_v35, %v993_v48  ;;  %v996_v44 = vshrl.u32 %v978_v16, %v994_v0 }
 0x15a   : > { %v999_v28 = vadd.s32 127, %v998_v15  ;;  %v669_v54 = vsel %vm667_vm15, %v668_v26, %v3615_v17  ;;  %v1039_v30 = vshrl.u32 %v1038_v19, 5  ;;  %v1041_v21 = vsub.s32 32, %v1040_v32 }
 0x15b   : > { %v670_v27 = vadd.s32 %v669_v54, %v665_v34  ;;  %v1043_v22 = vshll.u32 %v3150_v53, %v1040_v32  ;;  %v997_v38 = vor.u32 %v996_v44, %v995_v40  ;;  %v1046_v52 = vshll.u32 %v3151_v59, %v1040_v32 }
 0x15c   : > { %v1000_v41 = vshll.u32 %v999_v28, 23  ;;  %v1049_v57 = vshll.u32 %v4304_v61, %v1040_v32  ;;  %vm612_vm3 = vcmp.lt.s32.totalorder %v3300_v36, 0  ;;  %v1044_v35 = vshrl.u32 %v3151_v59, %v1041_v21 }
 0x15d   : > { %v671_v42 = vadd.s32 536870912, %v670_v27  ;;  %v1047_v8 = vshrl.u32 %v4304_v61, %v1041_v21  ;;  %v1052_v17 = vshll.u32 %v4302_v63, %v1040_v32  ;;  %v1050_v47 = vshrl.u32 %v4302_v63, %v1041_v21 }
 0x15e   : > { %v1001_v29 = vor.u32 4788187, %v1000_v41  ;;  %v1053_v13 = vshrl.u32 %v3154_v2, %v1041_v21  ;;  %v2690_v60 = vadd.s32 4294967169, %v718_v46  ;;  %v3653_v55 = vpop.eup %3054  ;;  %v1004_v5 = vcvt.s32.f32 %v997_v38 }
 0x15f   : > { %v672_v16 = vshrl.u32 %v671_v42, 30  ;;  %v1042_v48 = vshrl.u32 %v3150_v53, %v1041_v21  ;;  %v1055_v26 = vshll.u32 %v3154_v2, %v1040_v32  ;;  %v1045_v0 = vor.u32 %v1044_v35, %v1043_v22 }
 0x160   : > { %v1002_v19 = vand.u32 2147483647, %v1001_v29  ;;  %v1048_v15 = vor.u32 %v1047_v8, %v1046_v52  ;;  %v1056_v34 = vshrl.u32 %v4306_v9, %v1041_v21  ;;  %v3658_v40 = vpop.eup %3056  ;;  %vm3662_vm4 = vcmp.le.f32.partialorder %v610_v31, 0.7853982 }
 0x161   : > { %v673_v46 = vshll.u32 %v672_v16, 30  ;;  %v1051_v28 = vor.u32 %v1050_v47, %v1049_v57  ;;  %v1054_v54 = vor.u32 %v1053_v13, %v1052_v17  ;;  %vm1058_vm0 = vcmp.lt.s32.totalorder %v1039_v30, 1 }
 0x162   : > { %v1005_v38 = vmul.f32 %v1004_v5, %v1002_v19  ;;  %v696_v41 = vsub.s32 4, %v672_v16  ;;  %v1057_v32 = vor.u32 %v1056_v34, %v1055_v26  ;;  %vm1061_vm2 = vcmp.lt.s32.totalorder %v1039_v30, 4 }
 0x163   : > { %v3666_v22 = vsub.s32 %v670_v27, %v673_v46  ;;  %vm1059_vm5 = vcmp.lt.s32.totalorder %v1039_v30, 2  ;;  %vm1060_vm6 = vcmp.lt.s32.totalorder %v1039_v30, 3  ;;  %v1063_v21 = vsel %vm1061_vm2, %v1051_v28, 2102212464 }
 0x164   : > { %v1006_v52 = vxor.u32 2147483648, %v1005_v38  ;;  %v1062_v42 = vsel %vm1058_vm0, %v1042_v48, %v1045_v0  ;;  %v1064_v31 = vsel %vm1060_vm6, %v1048_v15, %v1063_v21  ;;  %v1066_v35 = vsel %vm1058_vm0, %v1045_v0, %v1048_v15 }
 0x165   : > { %v676_v8 = vsub.s32 0, %v3666_v22  ;;  %v1067_v57 = vsel %vm1061_vm2, %v1054_v54, 920167782  ;;  %v1070_v17 = vsel %vm1058_vm0, %v1048_v15, %v1051_v28  ;;  %v722_v29 = vor.u32 8388608, %v3640_v24 }
 0x166   : > { %v1007_v27 = vsel %vm924_vm7, %v1006_v52, %v1005_v38  ;;  %v697_v47 = vsel %vm612_vm3, %v696_v41, %v672_v16  ;;  %v1068_v13 = vsel %vm1060_vm6, %v1051_v28, %v1067_v57  ;;  %v1071_v5 = vsel %vm1061_vm2, %v1057_v32, 1326507024 }
 0x167   : > { %v2687_v48 = vmin.u32 %v676_v8, %v3666_v22  ;;  %v1065_v26 = vsel %vm1059_vm5, %v1062_v42, %v1064_v31  ;;  %v1069_v19 = vsel %vm1059_vm5, %v1066_v35, %v1068_v13  ;;  %v1072_v0 = vsel %vm1060_vm6, %v1054_v54, %v1071_v5 }
 0x168   : > { %v1010_v24 = vsel %vm3588_vm8, %v3296_v25, %v1007_v27  ;;  %v1073_v15 = vsel %vm1059_vm5, %v1070_v17, %v1072_v0  ;;  %v3688_v16 = vmul.u32.u64.low %v3634_v20, %v1069_v19  ;;  %v3689_v34 = vmul.u32.u64.high %v3634_v20, %v1069_v19, %v3688_v16 }
 0x169   : > { %v678_v46 = vclz %v2687_v48  ;;  %v3693_v28 = vmul.u32.u64.low %v3634_v20, %v1073_v15  ;;  %v3694_v38 = vmul.u32.u64.high %v3634_v20, %v1073_v15, %v3693_v28  ;;  %v4301_v41 = vand.u32 2147483647, %v3317_v51 }
 0x16a   : > { %3058 = vsinq.f32 %v3610_v62  ;;  %v666_v7 = vadd.s32 %v3614_v49, %v3619_v18  ;;  %v3702_v30 = vsel %vm3662_vm4, 0, %v697_v47  ;;  %v724_v54 = vadd.s32 1, %v2690_v60 }
 0x16b   : > { %3060 = vcosq.f32 %v1010_v24  ;;  %v2688_v32 = vadd.s32 4294967294, %v678_v46  ;;  %v1081_v21 = vmul.u32 %v3634_v20, %v1065_v26  ;;  %v1133_v52 = vand.u32 2139095040, %v3317_v51 }
 0x16c   : > { %3062 = vsinq.f32 %v1010_v24  ;;  %v1084_v42 = vadd.s32 1, %v3689_v34  ;;  %vm725_vm7 = vcmp.gt.s32.totalorder %v724_v54, 0  ;;  %v3707_v31 = vshll.u32 %v722_v29, 8 }
 0x16d   : > { %vm2689_vm8 = vcmp.lt.s32.totalorder %v2688_v32, 0  ;;  %vm1083_vm9 = vc.u32 %v3694_v38, %v3688_v16  ;;  %v726_v62 = vsel %vm725_vm7, %v724_v54, 0  ;;  %v3713_v49 = vand.u32 8388607, %v4301_v41 }
 0x16e   : > { %v681_v18 = vsel %vm2689_vm8, 0, %v2688_v32  ;;  %v1085_v20 = vsel %vm1083_vm9, %v1084_v42, %v3689_v34  ;;  %v728_v60 = vand.u32 31, %v726_v62  ;;  %v1134_v29 = vshrl.u32 %v1133_v52, 23 }
 0x16f   : > { %v682_v8 = vsub.s32 32, %v681_v18  ;;  %v686_v57 = vsub.s32 4294967266, %v681_v18  ;;  %v1086_v17 = vadd.s32 %v1085_v20, %v1081_v21  ;;  %v683_v27 = vshll.u32 %v3666_v22, %v681_v18 }
 0x170   : > { %v727_v47 = vshrl.u32 %v726_v62, 5  ;;  %v729_v13 = vsub.s32 32, %v728_v60  ;;  %v731_v5 = vshll.u32 %v3150_v53, %v728_v60  ;;  %v734_v0 = vshll.u32 %v3151_v59, %v728_v60 }
 0x171   : > { %v684_v48 = vshrl.u32 %v666_v7, %v682_v8  ;;  %v687_v26 = vadd.s32 127, %v686_v57  ;;  %v1087_v19 = vadd.s32 536870912, %v1086_v17  ;;  %vm1028_vm10 = vcmp.lt.s32.totalorder %v3302_v37, 0 }
 0x172   : > { %v732_v24 = vshrl.u32 %v3151_v59, %v729_v13  ;;  %v735_v15 = vshrl.u32 %v4304_v61, %v729_v13  ;;  %v737_v34 = vshll.u32 %v4304_v61, %v728_v60  ;;  %v738_v46 = vshrl.u32 %v4302_v63, %v729_v13 }
 0x173   : > { %v685_v22 = vor.u32 %v684_v48, %v683_v27  ;;  %v688_v28 = vshll.u32 %v687_v26, 23  ;;  %v1088_v54 = vshrl.u32 %v1087_v19, 30  ;;  %v741_v32 = vshrl.u32 %v3154_v2, %v729_v13 }
 0x174   : > { %v3726_v7 = vpop.eup %3058  ;;  %v730_v21 = vshrl.u32 %v3150_v53, %v729_v13  ;;  %v733_v52 = vor.u32 %v732_v24, %v731_v5  ;;  %v736_v42 = vor.u32 %v735_v15, %v734_v0  ;;  %v740_v62 = vshll.u32 %v4302_v63, %v728_v60  ;;  %v2266_v5 = vld [vmem:[%s4295_s2 + $0x8] sm:$0xff] }
 0x175   : > { %v3730_v18 = vpop.eup %3060  ;;  %v689_v20 = vor.u32 4788187, %v688_v28  ;;  %v1089_v8 = vshll.u32 %v1088_v54, 30  ;;  %v739_v57 = vor.u32 %v738_v46, %v737_v34  ;;  %v743_v1 = vshll.u32 %v3154_v2, %v728_v60 }
 0x176   : > { %v3733_v27 = vpop.eup %3062  ;;  %v692_v48 = vcvt.s32.f32 %v685_v22  ;;  %v1112_v26 = vsub.s32 4, %v1088_v54  ;;  %v742_v19 = vor.u32 %v741_v32, %v740_v62  ;;  %v744_v41 = vshrl.u32 %v4306_v9, %v729_v13 }
 0x177   : > { %v690_v35 = vand.u32 2147483647, %v689_v20  ;;  %vm3738_vm11 = vcmp.le.f32.partialorder %v1026_v45, 0.7853982  ;;  %v3742_v0 = vsub.s32 %v1086_v17, %v1089_v8  ;;  %vm746_vm12 = vcmp.lt.s32.totalorder %v727_v47, 1 }
 0x178   : > { %vm747_vm13 = vcmp.lt.s32.totalorder %v727_v47, 2  ;;  %v745_v24 = vor.u32 %v744_v41, %v743_v1  ;;  %vm748_vm14 = vcmp.lt.s32.totalorder %v727_v47, 3  ;;  %vm749_vm15 = vcmp.lt.s32.totalorder %v727_v47, 4 }
 0x179   : > { %v750_v60 = vsel %vm746_vm12, %v730_v21, %v733_v52  ;;  %v693_v15 = vmul.f32 %v692_v48, %v690_v35  ;;  %v1092_v34 = vsub.s32 0, %v3742_v0  ;;  %v751_v46 = vsel %vm749_vm15, %v739_v57, 2102212464 }
 0x17a   : > { %v754_v13 = vsel %vm746_vm12, %v733_v52, %v736_v42  ;;  %v752_v22 = vsel %vm748_vm14, %v736_v42, %v751_v46  ;;  %v755_v28 = vsel %vm749_vm15, %v742_v19, 920167782  ;;  %v758_v45 = vsel %vm746_vm12, %v736_v42, %v739_v57 }
 0x17b   : > { %v759_v32 = vsel %vm749_vm15, %v745_v24, 1326507024  ;;  %v694_v62 = vxor.u32 2147483648, %v693_v15  ;;  %v2703_v17 = vmin.u32 %v1092_v34, %v3742_v0  ;;  %v1113_v20 = vsel %vm1028_vm10, %v1112_v26, %v1088_v54 }
 0x17c   : > { %v756_v1 = vsel %vm748_vm14, %v739_v57, %v755_v28  ;;  %v753_v41 = vsel %vm747_vm13, %v750_v60, %v752_v22  ;;  %v760_v21 = vsel %vm748_vm14, %v742_v19, %v759_v32  ;;  %v2706_v52 = vadd.s32 4294967169, %v1134_v29 }
 0x17d   : > { %v757_v35 = vsel %vm747_vm13, %v754_v13, %v756_v1  ;;  %v695_v8 = vsel %vm612_vm3, %v694_v62, %v693_v15  ;;  %v1094_v42 = vclz %v2703_v17  ;;  %v761_v48 = vsel %vm747_vm13, %v758_v45, %v760_v21 }
 0x17e   : > { %v1138_v24 = vor.u32 8388608, %v3713_v49  ;;  %v698_v54 = vsel %vm3662_vm4, %v3300_v36, %v695_v8  ;;  %v3761_v57 = vmul.u32.u64.low %v3707_v31, %v761_v48  ;;  %v3762_v26 = vmul.u32.u64.high %v3707_v31, %v761_v48, %v3761_v57 }
 0x17f   : > { %v1140_v60 = vadd.s32 1, %v2706_v52  ;;  %v2704_v34 = vadd.s32 4294967294, %v1094_v42  ;;  %v3765_v29 = vmul.u32.u64.low %v3707_v31, %v757_v35  ;;  %v3766_v19 = vmul.u32.u64.high %v3707_v31, %v757_v35, %v3765_v29 }
 0x180   : > { %v1237_v47 = vand.u32 2139095040, %v3332_v14  ;;  %3064 = vcosq.f32 %v698_v54  ;;  %v1082_v49 = vadd.s32 %v3688_v16, %v3694_v38  ;;  %v3774_v44 = vsel %vm3738_vm11, 0, %v1113_v20 }
 0x181   : > { %4327 = vst [vmem:[#allocation6_spill] sm:$0xff] %v3774_v44  ;;  %vm1141_vm3 = vcmp.gt.s32.totalorder %v1140_v60, 0  ;;  %3066 = vsinq.f32 %v698_v54  ;;  %vm2705_vm4 = vcmp.lt.s32.totalorder %v2704_v34, 0  ;;  %v769_v15 = vmul.u32 %v3707_v31, %v753_v41 }
 0x182   : > { %v1142_v46 = vsel %vm1141_vm3, %v1140_v60, 0  ;;  %v1097_v13 = vsel %vm2705_vm4, 0, %v2704_v34  ;;  %vm771_vm0 = vc.u32 %v3762_v26, %v3765_v29  ;;  %v3781_v28 = vshll.u32 %v1138_v24, 8 }
 0x183   : > { %v3779_v22 = vshrl.u32 %v1142_v46, 5  ;;  %v1098_v45 = vsub.s32 32, %v1097_v13  ;;  %v1102_v16 = vsub.s32 4294967266, %v1097_v13  ;;  %v772_v38 = vadd.s32 1, %v3766_v19 }
 0x184   : > { %v3784_v32 = vshrl.u32 %v1237_v47, 23  ;;  %v1099_v62 = vshll.u32 %v3742_v0, %v1097_v13  ;;  %v1144_v17 = vand.u32 31, %v1142_v46  ;;  %vm716_vm7 = vcmp.lt.s32.totalorder %v3315_v50, 0 }
 0x185   : > { %vm1162_vm2 = vcmp.lt.s32.totalorder %v3779_v22, 1  ;;  %vm1164_vm5 = vcmp.lt.s32.totalorder %v3779_v22, 3  ;;  %v1100_v31 = vshrl.u32 %v1082_v49, %v1098_v45  ;;  %v1103_v20 = vadd.s32 127, %v1102_v16 }
 0x186   : > { %v773_v1 = vsel %vm771_vm0, %v772_v38, %v3766_v19  ;;  %vm1165_vm6 = vcmp.lt.s32.totalorder %v3779_v22, 4  ;;  %v1145_v35 = vsub.s32 32, %v1144_v17  ;;  %v1147_v21 = vshll.u32 %v3150_v53, %v1144_v17 }
 0x187   : > { %v774_v41 = vadd.s32 %v773_v1, %v769_v15  ;;  %v1150_v52 = vshll.u32 %v3151_v59, %v1144_v17  ;;  %v1101_v0 = vor.u32 %v1100_v31, %v1099_v62  ;;  %v1104_v8 = vshll.u32 %v1103_v20, 23 }
 0x188   : > { %v1153_v42 = vshll.u32 %v4304_v61, %v1144_v17  ;;  %v1156_v48 = vshll.u32 %v4302_v63, %v1144_v17  ;;  %v1146_v54 = vshrl.u32 %v3150_v53, %v1145_v35  ;;  %v1148_v57 = vshrl.u32 %v3151_v59, %v1145_v35 }
 0x189   : > { %v775_v24 = vadd.s32 536870912, %v774_v41  ;;  %v1151_v60 = vshrl.u32 %v4304_v61, %v1145_v35  ;;  %v1105_v34 = vor.u32 4788187, %v1104_v8  ;;  %v1108_v19 = vcvt.s32.f32 %v1101_v0 }
 0x18a   : > { %v1154_v47 = vshrl.u32 %v4302_v63, %v1145_v35  ;;  %v1157_v49 = vshrl.u32 %v3154_v2, %v1145_v35  ;;  %v3801_v15 = vpop.eup %3064  ;;  %vm3805_vm8 = vcmp.le.f32.partialorder %v714_v4, 0.7853982  ;;  %v1149_v45 = vor.u32 %v1148_v57, %v1147_v21 }
 0x18b   : > { %v776_v13 = vshrl.u32 %v775_v24, 30  ;;  %v1152_v16 = vor.u32 %v1151_v60, %v1150_v52  ;;  %v1159_v38 = vshll.u32 %v3154_v2, %v1144_v17  ;;  %v3810_v62 = vpop.eup %3066  ;;  %v1106_v31 = vand.u32 2147483647, %v1105_v34 }
 0x18c   : > { %v1155_v20 = vor.u32 %v1154_v47, %v1153_v42  ;;  %v1158_v1 = vor.u32 %v1157_v49, %v1156_v48  ;;  %v1160_v0 = vshrl.u32 %v4306_v9, %v1145_v35  ;;  %vm1163_vm9 = vcmp.lt.s32.totalorder %v3779_v22, 2  ;;  %v2267_v22 = vld [vmem:[%s4295_s2 + $0x10] sm:$0xff] }
 0x18d   : > { %v777_v8 = vshll.u32 %v776_v13, 30  ;;  %v800_v63 = vsub.s32 4, %v776_v13  ;;  %v1170_v4 = vsel %vm1162_vm2, %v1149_v45, %v1152_v16  ;;  %v1109_v61 = vmul.f32 %v1108_v19, %v1106_v31 }
 0x18e   : > { %v1161_v24 = vor.u32 %v1160_v0, %v1159_v38  ;;  %v1167_v21 = vsel %vm1165_vm6, %v1155_v20, 2102212464  ;;  %v1171_v17 = vsel %vm1165_vm6, %v1158_v1, 920167782  ;;  %v3822_v52 = vadd.s32 %v3765_v29, %v3762_v26  ;;  %v2273_v38 = vld [vmem:[%s4296_s3] sm:$0xff] }
 0x18f   : > { %v3824_v35 = vsub.s32 %v774_v41, %v777_v8  ;;  %v1172_v42 = vsel %vm1164_vm5, %v1155_v20, %v1171_v17  ;;  %v4330_v48 = vand.u32 2147483647, %v3332_v14  ;;  %v1110_v60 = vxor.u32 2147483648, %v1109_v61  ;;  %v2265_v0 = vld [vmem:[%s4295_s2] sm:$0xff] }
 0x190   : > { %v801_v34 = vsel %vm716_vm7, %v800_v63, %v776_v13  ;;  %v1166_v19 = vsel %vm1162_vm2, %v1146_v54, %v1149_v45  ;;  %v1173_v47 = vsel %vm1163_vm9, %v1170_v4, %v1172_v42  ;;  %v1168_v29 = vsel %vm1164_vm5, %v1152_v16, %v1167_v21  ;;  %v2275_v21 = vld [vmem:[%s4296_s3 + $0x10] sm:$0xff] }
 0x191   : > { %v1241_v57 = vand.u32 8388607, %v4330_v48  ;;  %v780_v26 = vsub.s32 0, %v3824_v35  ;;  %v1174_v41 = vsel %vm1162_vm2, %v1152_v16, %v1155_v20  ;;  %v1175_v49 = vsel %vm1165_vm6, %v1161_v24, 1326507024 }
 0x192   : > { %v1111_v63 = vsel %vm1028_vm10, %v1110_v60, %v1109_v61  ;;  %v1176_v54 = vsel %vm1164_vm5, %v1158_v1, %v1175_v49  ;;  %v3848_v13 = vmul.u32.u64.low %v3781_v28, %v1173_v47  ;;  %v3849_v45 = vmul.u32.u64.high %v3781_v28, %v1173_v47, %v3848_v13  ;;  %v2274_v1 = vld [vmem:[%s4296_s3 + $0x8] sm:$0xff]  ;;  %v2276_v60 = vld [vmem:[%s4296_s3 + $0x18] sm:$0xff]  ;;  %v2277_v49 = vld [vmem:[%s4296_s3 + $0x20] sm:$0xff] }
 0x193   : > { %v1114_v16 = vsel %vm3738_vm11, %v3302_v37, %v1111_v63  ;;  %v2691_v31 = vmin.u32 %v780_v26, %v3824_v35  ;;  %v1177_v61 = vsel %vm1163_vm9, %v1174_v41, %v1176_v54  ;;  %v2710_v20 = vadd.s32 4294967169, %v3784_v32  ;;  %v2278_v63 = vld [vmem:[%s4296_s3 + $0x28] sm:$0xff] }
 0x194   : > { %v3873_v8 = vsel %vm3805_vm8, 0, %v801_v34  ;;  %v1169_v4 = vsel %vm1163_vm9, %v1166_v19, %v1168_v29  ;;  %v3878_v32 = vmul.u32.u64.low %v3781_v28, %v1177_v61  ;;  %v3879_v24 = vmul.u32.u64.high %v3781_v28, %v1177_v61, %v3878_v32  ;;  %v2268_v34 = vld [vmem:[%s4295_s2 + $0x18] sm:$0xff] }
 0x195   : > { %v782_v17 = vclz %v2691_v31  ;;  %v1242_v42 = vor.u32 8388608, %v1241_v57  ;;  %v1244_v48 = vadd.s32 1, %v2710_v20  ;;  %3068 = vcosq.f32 %v1114_v16  ;;  %v2270_v31 = vld [vmem:[%s4295_s2 + $0x28] sm:$0xff] }
 0x196   : > { %v1188_v19 = vadd.s32 1, %v3849_v45  ;;  %v4307_v47 = vmov 0.0|0.0   ;;  %v2937_v57 = vpack.c.bf16 %v2274_v1, %v2273_v38  ;;  %v2949_v26 = vpack.c.bf16 %v2266_v5, %v2265_v0 }
 0x197   : > { %2936 = vmatprep.subr.bf16.mxu1 %v4307_v47  ;;  %2948 = vmatprep.subr.bf16.mxu0 %v4307_v47  ;;  %3070 = vsinq.f32 %v1114_v16  ;;  %v2692_v29 = vadd.s32 4294967294, %v782_v17  ;;  %v1185_v41 = vmul.u32 %v3781_v28, %v1169_v4  ;;  %vm1245_vm10 = vcmp.gt.s32.totalorder %v1244_v48, 0  ;;  %v2269_v28 = vld [vmem:[%s4295_s2 + $0x20] sm:$0xff] }
 0x198   : > { %vm1187_vm11 = vc.u32 %v3879_v24, %v3848_v13  ;;  %v1246_v54 = vsel %vm1245_vm10, %v1244_v48, 0  ;;  %2938 = vmatpush3.bf16.msra.mxu1 %v2937_v57  ;;  %2950 = vmatpush3.bf16.msra.mxu0 %v2949_v26  ;;  %v2940_v38 = vpack.c.bf16 %v2276_v60, %v2275_v21  ;;  %v2952_v16 = vpack.c.bf16 %v2268_v34, %v2267_v22  ;;  %v2280_v57 = vld [vmem:[%s4296_s3 + $0x38] sm:$0xff] }
 0x199   : > { %vm2693_vm12 = vcmp.lt.s32.totalorder %v2692_v29, 0  ;;  %v1189_v61 = vsel %vm1187_vm11, %v1188_v19, %v3849_v45  ;;  %v1248_v20 = vand.u32 31, %v1246_v54  ;;  %v3912_v1 = vshll.u32 %v1242_v42, 8  ;;  %2939 = vmatprep.subr.bf16.mxu1 %v4307_v47  ;;  %2951 = vmatprep.subr.bf16.mxu0 %v4307_v47  ;;  %v2279_v19 = vld [vmem:[%s4296_s3 + $0x30] sm:$0xff] }
 0x19a   : > { %v785_v0 = vsel %vm2693_vm12, 0, %v2692_v29  ;;  %v1190_v5 = vadd.s32 %v1189_v61, %v1185_v41  ;;  %v3916_v4 = vshrl.u32 %v1246_v54, 5  ;;  %v2943_v32 = vpack.c.bf16 %v2278_v63, %v2277_v49 }
 0x19b   : > { %v786_v21 = vsub.s32 32, %v785_v0  ;;  %v790_v17 = vsub.s32 4294967266, %v785_v0  ;;  %v1249_v48 = vsub.s32 32, %v1248_v20  ;;  %v2955_v60 = vpack.c.bf16 %v2270_v31, %v2269_v28 }
 0x19c   : > { %v787_v22 = vshll.u32 %v3824_v35, %v785_v0  ;;  %v1191_v34 = vadd.s32 536870912, %v1190_v5  ;;  %v1251_v45 = vshll.u32 %v3150_v53, %v1248_v20  ;;  %v1254_v42 = vshll.u32 %v3151_v59, %v1248_v20  ;;  %2941 = vmatpush3.bf16.msra.mxu1 %v2940_v38  ;;  %2953 = vmatpush3.bf16.msra.mxu0 %v2952_v16 }
 0x19d   : > { %v788_v26 = vshrl.u32 %v3822_v52, %v786_v21  ;;  %v791_v29 = vadd.s32 127, %v790_v17  ;;  %v1252_v35 = vshrl.u32 %v3151_v59, %v1249_v48  ;;  %v4331_v41 = vmov 2131351028   ;;  %2942 = vmatprep.subr.bf16.mxu1 %v4307_v47  ;;  %2954 = vmatprep.subr.bf16.mxu0 %v4307_v47 }
 0x19e   : > { %v1257_v49 = vshll.u32 %v4331_v41, %v1248_v20  ;;  %vm1132_vm13 = vcmp.lt.s32.totalorder %v3317_v51, 0  ;;  %v1192_v63 = vshrl.u32 %v1191_v34, 30  ;;  %v1255_v54 = vshrl.u32 %v4331_v41, %v1249_v48 }
 0x19f   : > { %v4332_v38 = vmov 2102212464   ;;  %v789_v31 = vor.u32 %v788_v26, %v787_v22  ;;  %v792_v52 = vshll.u32 %v791_v29, 23  ;;  %v1261_v61 = vshrl.u32 %v3154_v2, %v1249_v48  ;;  %v3937_v0 = vpop.eup %3068 }
 0x1a0   : > { %v1258_v16 = vshrl.u32 %v4332_v38, %v1249_v48  ;;  %v1260_v28 = vshll.u32 %v4332_v38, %v1248_v20  ;;  %v2946_v59 = vpack.c.bf16 %v2280_v57, %v2279_v19  ;;  %v1193_v21 = vshll.u32 %v1192_v63, 30  ;;  %2944 = vmatpush3.bf16.msra.mxu1 %v2943_v32  ;;  %2956 = vmatpush3.bf16.msra.mxu0 %v2955_v60 }
 0x1a1   : > { %v1216_v17 = vsub.s32 4, %v1192_v63  ;;  %v1250_v9 = vshrl.u32 %v3150_v53, %v1249_v48  ;;  %v1253_v47 = vor.u32 %v1252_v35, %v1251_v45  ;;  %v3940_v34 = vpop.eup %3070  ;;  %v793_v41 = vor.u32 4788187, %v792_v52 }
 0x1a2   : > { %v1256_v37 = vor.u32 %v1255_v54, %v1254_v42  ;;  %v1262_v44 = vor.u32 %v1261_v61, %v1260_v28  ;;  %v1263_v22 = vshll.u32 %v3154_v2, %v1248_v20  ;;  %v4333_v26 = vmov 0.0|0.0  }
 0x1a3   : > { %2945 = vmatprep.subr.bf16.mxu1 %v4333_v26  ;;  %2957 = vmatprep.subr.bf16.mxu0 %v4333_v26  ;;  %v4334_v19 = vand.u32 2147483647, %v3317_v51  ;;  %v3951_v53 = vsub.s32 %v1190_v5, %v1193_v21  ;;  %v1259_v32 = vor.u32 %v1258_v16, %v1257_v49  ;;  %v4337_v60 = vmov 1326507024  }
 0x1a4   : > { %v1264_v45 = vshrl.u32 %v4337_v60, %v1249_v48  ;;  %vm1266_vm15 = vcmp.lt.s32.totalorder %v3916_v4, 1  ;;  %v794_v42 = vand.u32 2147483647, %v793_v41  ;;  %v796_v29 = vcvt.s32.f32 %v789_v31  ;;  %2947 = vmatpush3.bf16.msra.mxu1 %v2946_v59  ;;  %v2271_v31 = vld [vmem:[%s4295_s2 + $0x30] sm:$0xff] }
 0x1a5   : > { %vm3947_vm14 = vcmp.le.f32.partialorder %v4334_v19, 0.7853982  ;;  %vm1267_vm3 = vcmp.lt.s32.totalorder %v3916_v4, 2  ;;  %vm1268_vm4 = vcmp.lt.s32.totalorder %v3916_v4, 3  ;;  %v1196_v2 = vsub.s32 0, %v3951_v53 }
 0x1a6   : > { %v1265_v20 = vor.u32 %v1264_v45, %v1263_v22  ;;  %vm1269_vm0 = vcmp.lt.s32.totalorder %v3916_v4, 4  ;;  %v1270_v5 = vsel %vm1266_vm15, %v1250_v9, %v1253_v47  ;;  %v797_v35 = vmul.f32 %v796_v29, %v794_v42 }
 0x1a7   : > { %v1271_v48 = vsel %vm1269_vm0, %v1259_v32, 2102212464  ;;  %v1274_v49 = vsel %vm1266_vm15, %v1253_v47, %v1256_v37  ;;  %v1275_v54 = vsel %vm1269_vm0, %v1262_v44, 920167782  ;;  %v2707_v38 = vmin.u32 %v1196_v2, %v3951_v53  ;;  %v2272_v47 = vld [vmem:[%s4295_s2 + $0x38] sm:$0xff] }
 0x1a8   : > { %v1272_v16 = vsel %vm1268_vm4, %v1256_v37, %v1271_v48  ;;  %v1276_v28 = vsel %vm1268_vm4, %v1259_v32, %v1275_v54  ;;  %v1278_v9 = vsel %vm1266_vm15, %v1256_v37, %v1259_v32  ;;  %v798_v52 = vxor.u32 2147483648, %v797_v35 }
 0x1a9   : > { %v1217_v61 = vsel %vm1132_vm13, %v1216_v17, %v1192_v63  ;;  %v1277_v59 = vsel %vm1267_vm3, %v1274_v49, %v1276_v28  ;;  %v1279_v21 = vsel %vm1269_vm0, %v1265_v20, 1326507024  ;;  %vm494_vm2 = vweird.f32 %v3282_v11 }
 0x1aa   : > { %v1198_v37 = vclz %v2707_v38  ;;  %v1280_v41 = vsel %vm1268_vm4, %v1262_v44, %v1279_v21  ;;  %v3990_v22 = vmul.u32.u64.low %v3912_v1, %v1277_v59  ;;  %v3991_v26 = vmul.u32.u64.high %v3912_v1, %v1277_v59, %v3990_v22 }
 0x1ab   : > { %v799_v19 = vsel %vm716_vm7, %v798_v52, %v797_v35  ;;  %v1273_v63 = vsel %vm1267_vm3, %v1270_v5, %v1272_v16  ;;  %v1281_v17 = vsel %vm1267_vm3, %v1278_v9, %v1280_v41  ;;  %v2958_v32 = vpack.c.bf16 %v2272_v47, %v2271_v31 }
 0x1ac   : > { %v802_v60 = vsel %vm3805_vm8, %v3315_v50, %v799_v19  ;;  %v2708_v45 = vadd.s32 4294967294, %v1198_v37  ;;  %v4003_v44 = vmul.u32.u64.low %v3912_v1, %v1281_v17  ;;  %v4004_v42 = vmul.u32.u64.high %v3912_v1, %v1281_v17, %v4003_v44 }
 0x1ad   : > { %v1186_v29 = vadd.s32 %v3848_v13, %v3879_v24  ;;  %v4010_v2 = vsel %vm3947_vm14, 0, %v1217_v61  ;;  %2959 = vmatpush3.bf16.msra.mxu0 %v2958_v32  ;;  %v499_v4 = vxor.u32 2147483648, %v3575_v43  ;;  %v502_v20 = vxor.u32 2147483648, %v3569_v58 }
 0x1ae   : > { %vm2709_vm5 = vcmp.lt.s32.totalorder %v2708_v45, 0  ;;  %v1289_v46 = vmul.u32 %v3912_v1, %v1273_v63  ;;  %v1292_v5 = vadd.s32 1, %v3991_v26  ;;  %vm1433_vm6 = vcmp.eq.s32.totalorder %v3464_v6, 0 }
 0x1af   : > { %3072 = vsinq.f32 %v802_v60  ;;  %v1201_v35 = vsel %vm2709_vm5, 0, %v2708_v45  ;;  %vm1432_vm7 = vcmp.lt.s32.totalorder %v3464_v6, 2  ;;  %v1435_v13 = vsel %vm1433_vm6, %v3569_v58, %v499_v4 }
 0x1b0   : > { %v1202_v24 = vsub.s32 32, %v1201_v35  ;;  %v1206_v48 = vsub.s32 4294967266, %v1201_v35  ;;  %vm1436_vm8 = vcmp.eq.s32.totalorder %v3464_v6, 2  ;;  %vm2281_vm9 = vcmask 523264  }
 0x1b1   : > { %v1203_v49 = vshll.u32 %v3951_v53, %v1201_v35  ;;  %vm1291_vm10 = vc.u32 %v4004_v42, %v3990_v22  ;;  %v1438_v1 = vsel %vm1436_vm8, %v502_v20, %v3575_v43  ;;  %vm498_vm11 = vcmp.eq.s32.totalorder %v3468_v3, 0 }
 0x1b2   : > { %v1204_v54 = vshrl.u32 %v1186_v29, %v1202_v24  ;;  %v1207_v38 = vadd.s32 127, %v1206_v48  ;;  %v1293_v16 = vsel %vm1291_vm10, %v1292_v5, %v3991_v26  ;;  %v1439_v28 = vsel %vm1432_vm7, %v1435_v13, %v1438_v1 }
 0x1b3   : > { %v1294_v9 = vadd.s32 %v1293_v16, %v1289_v46  ;;  %v1440_v31 = vsel %vm494_vm2, nan, %v1439_v28  ;;  %v500_v6 = vsel %vm498_vm11, %v3569_v58, %v499_v4  ;;  %vm501_vm12 = vcmp.eq.s32.totalorder %v3468_v3, 2 }
 0x1b4   : > { %v1205_v53 = vor.u32 %v1204_v54, %v1203_v49  ;;  %v1208_v47 = vshll.u32 %v1207_v38, 23  ;;  %2867 = vmatmul.mubr.msk.f32.vlgmr.msra.gmra.mrb[10].mxu1 %vm2281_vm9, %v1440_v31  ;;  %vm497_vm15 = vcmp.lt.s32.totalorder %v3468_v3, 2  ;;  %v503_v52 = vsel %vm501_vm12, %v502_v20, %v3575_v43 }
 0x1b5   : > { %v1295_v61 = vadd.s32 536870912, %v1294_v9  ;;  %v504_v59 = vsel %vm497_vm15, %v500_v6, %v503_v52  ;;  %v4338_v21 = vmov 0.0   ;;  %v603_v37 = vxor.u32 2147483648, %v3726_v7 }
 0x1b6   : > { %2869 = vmatprep.mubr.msk.f32.mxu1 %vm3149_vm1, %v4338_v21  ;;  %v606_v41 = vxor.u32 2147483648, %v3658_v40  ;;  %3074 = vcosq.f32 %v802_v60  ;;  %v1209_v58 = vor.u32 4788187, %v1208_v47  ;;  %v505_v26 = vsel %vm494_vm2, nan, %v504_v59 }
 0x1b7   : > { %v1534_v19 = vand.u32 3, %v3562_v56  ;;  %v4040_v3 = vadd.s32 %v3990_v22, %v4004_v42  ;;  %v1296_v43 = vshrl.u32 %v1295_v61, 30  ;;  %2910 = vmatmul.mubr.msk.f32.vlgmr.msra.gmra.mrb[8].mxu0 %vm2281_vm9, %v505_v26  ;;  %vm598_vm3 = vweird.f32 %v3294_v23 }
 0x1b8   : > { %v599_v63 = vadd.s32 3, %v3562_v56  ;;  %v1210_v17 = vand.u32 2147483647, %v1209_v58  ;;  %v1212_v32 = vcvt.s32.f32 %v1205_v53  ;;  %vm1236_vm4 = vcmp.lt.s32.totalorder %v3332_v14, 0  ;;  %2912 = vmatprep.mubr.msk.f32.mxu0 %vm3149_vm1, %v4338_v21 }
 0x1b9   : > { %vm1536_vm0 = vcmp.eq.s32.totalorder %v1534_v19, 0  ;;  %vm1539_vm2 = vcmp.eq.s32.totalorder %v1534_v19, 2  ;;  %v4048_v11 = vpop.eup %3072  ;;  %v1297_v22 = vshll.u32 %v1296_v43, 30  ;;  %vm1535_vm5 = vcmp.lt.s32.totalorder %v1534_v19, 2 }
 0x1ba   : > { %v1538_v60 = vsel %vm1536_vm0, %v3658_v40, %v603_v37  ;;  %v1541_v45 = vsel %vm1539_vm2, %v606_v41, %v3726_v7  ;;  %vm702_vm6 = vweird.f32 %v3300_v36  ;;  %v1213_v56 = vmul.f32 %v1212_v32, %v1210_v17 }
 0x1bb   : > { %v1542_v44 = vsel %vm1535_vm5, %v1538_v60, %v1541_v45  ;;  %v600_v42 = vand.u32 3, %v599_v63  ;;  %v707_v29 = vxor.u32 2147483648, %v3810_v62  ;;  %v4054_v4 = vsub.s32 %v1294_v9, %v1297_v22 }
 0x1bc   : > { %v1320_v20 = vsub.s32 4, %v1296_v43  ;;  %v1543_v46 = vsel %vm598_vm3, nan, %v1542_v44  ;;  %v1637_v5 = vand.u32 3, %v3702_v30  ;;  %v1214_v35 = vxor.u32 2147483648, %v1213_v56 }
 0x1bd   : > { %2870 = vmatmul.mubr.msk.f32.gmra.mrb[12].mxu1 %vm2281_vm9, %v1543_v46  ;;  %vm601_vm7 = vcmp.lt.s32.totalorder %v600_v42, 2  ;;  %vm602_vm8 = vcmp.eq.s32.totalorder %v600_v42, 0  ;;  %v710_v13 = vxor.u32 2147483648, %v3801_v15  ;;  %v1300_v24 = vsub.s32 0, %v4054_v4 }
 0x1be   : > { %v604_v48 = vsel %vm602_vm8, %v3658_v40, %v603_v37  ;;  %vm605_vm10 = vcmp.eq.s32.totalorder %v600_v42, 2  ;;  %2872 = vmatprep.mubr.msk.f32.mxu1 %vm3149_vm1, %v4338_v21  ;;  %vm1638_vm11 = vcmp.lt.s32.totalorder %v1637_v5, 2  ;;  %v1215_v49 = vsel %vm1132_vm13, %v1214_v35, %v1213_v56 }
 0x1bf   : > { %v607_v1 = vsel %vm605_vm10, %v606_v41, %v3726_v7  ;;  %vm1639_vm12 = vcmp.eq.s32.totalorder %v1637_v5, 0  ;;  %vm1642_vm15 = vcmp.eq.s32.totalorder %v1637_v5, 2  ;;  %v1218_v54 = vsel %vm3947_vm14, %v3317_v51, %v1215_v49 }
 0x1c0   : > { %v2711_v38 = vmin.u32 %v1300_v24, %v4054_v4  ;;  %v608_v16 = vsel %vm601_vm7, %v604_v48, %v607_v1  ;;  %v1641_v40 = vsel %vm1639_vm12, %v3801_v15, %v707_v29  ;;  %v3075_v28 = vpop.eup %3074  ;;  %3076 = vcosq.f32 %v1218_v54 }
 0x1c1   : > { %v609_v9 = vsel %vm598_vm3, nan, %v608_v16  ;;  %v1644_v31 = vsel %vm1642_vm15, %v710_v13, %v3810_v62  ;;  %v703_v7 = vadd.s32 3, %v3702_v30  ;;  %3078 = vsinq.f32 %v1218_v54 }
 0x1c2   : > { %v1302_v6 = vclz %v2711_v38  ;;  %v4079_v57 = vsel %vm1236_vm4, %v1320_v20, %v1296_v43  ;;  %2913 = vmatmul.mubr.msk.f32.gmra.mrb[10].mxu0 %vm2281_vm9, %v609_v9  ;;  %v1645_v53 = vsel %vm1638_vm11, %v1641_v40, %v1644_v31  ;;  %vm806_vm13 = vweird.f32 %v3315_v50 }
 0x1c3   : > { %2915 = vmatprep.mubr.msk.f32.mxu0 %vm3149_vm1, %v4338_v21  ;;  %v1646_v23 = vsel %vm702_vm6, nan, %v1645_v53  ;;  %v704_v47 = vand.u32 3, %v703_v7  ;;  %v811_v30 = vxor.u32 2147483648, %v4048_v11  ;;  %v814_v61 = vxor.u32 2147483648, %v3075_v28 }
 0x1c4   : > { %v2712_v52 = vadd.s32 4294967294, %v1302_v6  ;;  %2873 = vmatmul.mubr.msk.f32.gmra.mrb[14].mxu1 %vm2281_vm9, %v1646_v23  ;;  %v1740_v59 = vand.u32 3, %v3873_v8  ;;  %v807_v37 = vadd.s32 3, %v3873_v8  ;;  %v915_v41 = vxor.u32 2147483648, %v3653_v55 }
 0x1c5   : > { %vm705_vm14 = vcmp.lt.s32.totalorder %v704_v47, 2  ;;  %vm706_vm3 = vcmp.eq.s32.totalorder %v704_v47, 0  ;;  %vm709_vm0 = vcmp.eq.s32.totalorder %v704_v47, 2  ;;  %2875 = vmatprep.mubr.msk.f32.mxu1 %vm3149_vm1, %v4338_v21  ;;  %v1843_v42 = vand.u32 3, %v3531_v33 }
 0x1c6   : > { %vm2713_vm2 = vcmp.lt.s32.totalorder %v2712_v52, 0  ;;  %v708_v58 = vsel %vm706_vm3, %v3801_v15, %v707_v29  ;;  %v711_v26 = vsel %vm709_vm0, %v710_v13, %v3810_v62  ;;  %vm1741_vm5 = vcmp.lt.s32.totalorder %v1740_v59, 2 }
 0x1c7   : > { %v1305_v19 = vsel %vm2713_vm2, 0, %v2712_v52  ;;  %v712_v43 = vsel %vm705_vm14, %v708_v58, %v711_v26  ;;  %vm1742_vm7 = vcmp.eq.s32.totalorder %v1740_v59, 0  ;;  %vm1745_vm8 = vcmp.eq.s32.totalorder %v1740_v59, 2 }
 0x1c8   : > { %v1306_v63 = vsub.s32 32, %v1305_v19  ;;  %v1307_v8 = vshll.u32 %v4054_v4, %v1305_v19  ;;  %v1310_v17 = vsub.s32 4294967266, %v1305_v19  ;;  %v713_v32 = vsel %vm702_vm6, nan, %v712_v43  ;;  %v4342_v43 = vld [vmem:[#allocation6_spill] sm:$0xff] }
 0x1c9   : > { %2916 = vmatmul.mubr.msk.f32.gmra.mrb[12].mxu0 %vm2281_vm9, %v713_v32  ;;  %v1744_v22 = vsel %vm1742_vm7, %v3075_v28, %v811_v30  ;;  %v1747_v60 = vsel %vm1745_vm8, %v814_v61, %v4048_v11  ;;  %v808_v15 = vand.u32 3, %v807_v37  ;;  %v918_v62 = vxor.u32 2147483648, %v3593_v39 }
 0x1ca   : > { %v1308_v45 = vshrl.u32 %v4040_v3, %v1306_v63  ;;  %v1311_v56 = vadd.s32 127, %v1310_v17  ;;  %2918 = vmatprep.mubr.msk.f32.mxu0 %vm3149_vm1, %v4338_v21  ;;  %v1748_v44 = vsel %vm1741_vm5, %v1744_v22, %v1747_v60  ;;  %v4108_v36 = vpop.eup %3076  ;;  %vm910_vm12 = vweird.f32 %v3284_v12  ;;  %v4343_v17 = vld [vmem:[#allocation5_spill] sm:$0xff] }
 0x1cb   : > { %v1749_v29 = vsel %vm806_vm13, nan, %v1748_v44  ;;  %vm809_vm6 = vcmp.lt.s32.totalorder %v808_v15, 2  ;;  %vm810_vm10 = vcmp.eq.s32.totalorder %v808_v15, 0  ;;  %vm813_vm11 = vcmp.eq.s32.totalorder %v808_v15, 2  ;;  %v4112_v4 = vpop.eup %3078 }
 0x1cc   : > { %v1309_v20 = vor.u32 %v1308_v45, %v1307_v8  ;;  %v1312_v3 = vshll.u32 %v1311_v56, 23  ;;  %2876 = vmatmul.mubr.msk.f32.gmra.mrb[16].mxu1 %vm2281_vm9, %v1749_v29  ;;  %v812_v46 = vsel %vm810_vm10, %v3075_v28, %v811_v30  ;;  %v815_v5 = vsel %vm813_vm11, %v814_v61, %v4048_v11 }
 0x1cd   : > { %v816_v35 = vsel %vm809_vm6, %v812_v46, %v815_v5  ;;  %2878 = vmatprep.mubr.msk.f32.mxu1 %vm3149_vm1, %v4338_v21  ;;  %vm1844_vm15 = vcmp.lt.s32.totalorder %v1843_v42, 2  ;;  %vm1845_vm14 = vcmp.eq.s32.totalorder %v1843_v42, 0  ;;  %v4339_v13 = vand.u32 2147483647, %v3332_v14 }
 0x1ce   : > { %v1313_v48 = vor.u32 4788187, %v1312_v3  ;;  %v817_v49 = vsel %vm806_vm13, nan, %v816_v35  ;;  %v1847_v11 = vsel %vm1845_vm14, %v3593_v39, %v915_v41  ;;  %vm1848_vm0 = vcmp.eq.s32.totalorder %v1843_v42, 2 }
 0x1cf   : > { %vm4121_vm3 = vcmp.le.f32.partialorder %v4339_v13, 0.7853982  ;;  %v1316_v1 = vcvt.s32.f32 %v1309_v20  ;;  %2919 = vmatmul.mubr.msk.f32.gmra.mrb[14].mxu0 %vm2281_vm9, %v817_v49  ;;  %v1850_v54 = vsel %vm1848_vm0, %v918_v62, %v3653_v55  ;;  %v911_v38 = vadd.s32 3, %v3531_v33 }
 0x1d0   : > { %v1019_v16 = vxor.u32 2147483648, %v3733_v27  ;;  %v1314_v40 = vand.u32 2147483647, %v1313_v48  ;;  %2921 = vmatprep.mubr.msk.f32.mxu0 %vm3149_vm1, %v4338_v21  ;;  %v1851_v50 = vsel %vm1844_vm15, %v1847_v11, %v1850_v54  ;;  %v1022_v28 = vxor.u32 2147483648, %v3730_v18 }
 0x1d1   : > { %v1946_v9 = vand.u32 3, %v3630_v10  ;;  %v1852_v31 = vsel %vm910_vm12, nan, %v1851_v50  ;;  %v912_v7 = vand.u32 3, %v911_v38  ;;  %vm1014_vm13 = vweird.f32 %v3296_v25 }
 0x1d2   : > { %v1015_v6 = vadd.s32 3, %v3630_v10  ;;  %v1317_v33 = vmul.f32 %v1316_v1, %v1314_v40  ;;  %2879 = vmatmul.mubr.msk.f32.gmra.mrb[18].mxu1 %vm2281_vm9, %v1852_v31  ;;  %v1123_v37 = vxor.u32 2147483648, %v3940_v34  ;;  %v2049_v63 = vand.u32 3, %v4342_v43 }
 0x1d3   : > { %vm1947_vm2 = vcmp.lt.s32.totalorder %v1946_v9, 2  ;;  %vm1948_vm5 = vcmp.eq.s32.totalorder %v1946_v9, 0  ;;  %vm1951_vm7 = vcmp.eq.s32.totalorder %v1946_v9, 2  ;;  %vm913_vm8 = vcmp.lt.s32.totalorder %v912_v7, 2  ;;  %2881 = vmatprep.mubr.msk.f32.mxu1 %vm3149_vm1, %v4338_v21 }
 0x1d4   : > { %vm914_vm6 = vcmp.eq.s32.totalorder %v912_v7, 0  ;;  %vm917_vm10 = vcmp.eq.s32.totalorder %v912_v7, 2  ;;  %v1950_v53 = vsel %vm1948_vm5, %v3730_v18, %v1019_v16  ;;  %v1318_v23 = vxor.u32 2147483648, %v1317_v33 }
 0x1d5   : > { %v916_v47 = vsel %vm914_vm6, %v3593_v39, %v915_v41  ;;  %v919_v10 = vsel %vm917_vm10, %v918_v62, %v3653_v55  ;;  %v1953_v30 = vsel %vm1951_vm7, %v1022_v28, %v3733_v27  ;;  %v1016_v59 = vand.u32 3, %v1015_v6 }
 0x1d6   : > { %v920_v52 = vsel %vm913_vm8, %v916_v47, %v919_v10  ;;  %v1954_v61 = vsel %vm1947_vm2, %v1950_v53, %v1953_v30  ;;  %v1319_v58 = vsel %vm1236_vm4, %v1318_v23, %v1317_v33  ;;  %v1126_v39 = vxor.u32 2147483648, %v3937_v0 }
 0x1d7   : > { %v921_v26 = vsel %vm910_vm12, nan, %v920_v52  ;;  %v1955_v19 = vsel %vm1014_vm13, nan, %v1954_v61  ;;  %v1322_v55 = vsel %vm4121_vm3, %v3332_v14, %v1319_v58  ;;  %vm1017_vm11 = vcmp.lt.s32.totalorder %v1016_v59, 2 }
 0x1d8   : > { %2922 = vmatmul.mubr.msk.f32.gmra.mrb[16].mxu0 %vm2281_vm9, %v921_v26  ;;  %2882 = vmatmul.mubr.msk.f32.gmra.mrb[20].mxu1 %vm2281_vm9, %v1955_v19  ;;  %vm1018_vm15 = vcmp.eq.s32.totalorder %v1016_v59, 0  ;;  %vm1021_vm14 = vcmp.eq.s32.totalorder %v1016_v59, 2  ;;  %3080 = vcosq.f32 %v1322_v55  ;;  %vm1118_vm4 = vweird.f32 %v4343_v17 }
 0x1d9   : > { %2924 = vmatprep.mubr.msk.f32.mxu0 %vm3149_vm1, %v4338_v21  ;;  %v1020_v12 = vsel %vm1018_vm15, %v3730_v18, %v1019_v16  ;;  %v1023_v41 = vsel %vm1021_vm14, %v1022_v28, %v3733_v27  ;;  %2884 = vmatprep.mubr.msk.f32.mxu1 %vm3149_vm1, %v4338_v21  ;;  %3082 = vsinq.f32 %v1322_v55  ;;  %v1119_v32 = vadd.s32 3, %v4342_v43 }
 0x1da   : > { %v1024_v8 = vsel %vm1017_vm11, %v1020_v12, %v1023_v41  ;;  %vm2050_vm12 = vcmp.lt.s32.totalorder %v2049_v63, 2  ;;  %vm2051_vm0 = vcmp.eq.s32.totalorder %v2049_v63, 0  ;;  %vm2054_vm2 = vcmp.eq.s32.totalorder %v2049_v63, 2 }
 0x1db   : > { %v1025_v22 = vsel %vm1014_vm13, nan, %v1024_v8  ;;  %v2053_v18 = vsel %vm2051_vm0, %v3937_v0, %v1123_v37  ;;  %v2056_v27 = vsel %vm2054_vm2, %v1126_v39, %v3940_v34  ;;  %v1120_v60 = vand.u32 3, %v1119_v32 }
 0x1dc   : > { %2925 = vmatmul.mubr.msk.f32.gmra.mrb[18].mxu0 %vm2281_vm9, %v1025_v22  ;;  %v1227_v15 = vxor.u32 2147483648, %v4112_v4  ;;  %v2057_v62 = vsel %vm2050_vm12, %v2053_v18, %v2056_v27  ;;  %v1230_v45 = vxor.u32 2147483648, %v4108_v36  ;;  %v2152_v25 = vand.u32 3, %v4010_v2 }
 0x1dd   : > { %2927 = vmatprep.mubr.msk.f32.mxu0 %vm3149_vm1, %v4338_v21  ;;  %v1223_v56 = vadd.s32 3, %v4010_v2  ;;  %v1323_v44 = vsel %vm4121_vm3, 0, %v4079_v57  ;;  %v2058_v42 = vsel %vm1118_vm4, nan, %v2057_v62  ;;  %vm1122_vm13 = vcmp.eq.s32.totalorder %v1120_v60, 0 }
 0x1de   : > { %vm1125_vm5 = vcmp.eq.s32.totalorder %v1120_v60, 2  ;;  %2885 = vmatmul.mubr.msk.f32.gmra.mrb[22].mxu1 %vm2281_vm9, %v2058_v42  ;;  %vm1121_vm7 = vcmp.lt.s32.totalorder %v1120_v60, 2  ;;  %v1124_v29 = vsel %vm1122_vm13, %v3937_v0, %v1123_v37  ;;  %vm2154_vm8 = vcmp.eq.s32.totalorder %v2152_v25, 0 }
 0x1df   : > { %v1127_v20 = vsel %vm1125_vm5, %v1126_v39, %v3940_v34  ;;  %2887 = vmatprep.mubr.msk.f32.mxu1 %vm3149_vm1, %v4338_v21  ;;  %v2156_v2 = vsel %vm2154_vm8, %v4108_v36, %v1227_v15  ;;  %vm2157_vm3 = vcmp.eq.s32.totalorder %v2152_v25, 2  ;;  %v1224_v57 = vand.u32 3, %v1223_v56 }
 0x1e0   : > { %v1128_v3 = vsel %vm1121_vm7, %v1124_v29, %v1127_v20  ;;  %vm2153_vm6 = vcmp.lt.s32.totalorder %v2152_v25, 2  ;;  %v2159_v5 = vsel %vm2157_vm3, %v1230_v45, %v4112_v4  ;;  %v2255_v35 = vand.u32 3, %v1323_v44 }
 0x1e1   : > { %v1129_v46 = vsel %vm1118_vm4, nan, %v1128_v3  ;;  %vm1222_vm10 = vweird.f32 %v3317_v51  ;;  %v2160_v0 = vsel %vm2153_vm6, %v2156_v2, %v2159_v5  ;;  %vm1226_vm11 = vcmp.eq.s32.totalorder %v1224_v57, 0 }
 0x1e2   : > { %2928 = vmatmul.mubr.msk.f32.gmra.mrb[20].mxu0 %vm2281_vm9, %v1129_v46  ;;  %vm1229_vm15 = vcmp.eq.s32.totalorder %v1224_v57, 2  ;;  %v3081_v34 = vpop.eup %3080  ;;  %v2161_v13 = vsel %vm1222_vm10, nan, %v2160_v0  ;;  %vm1225_vm14 = vcmp.lt.s32.totalorder %v1224_v57, 2  ;;  %v1228_v24 = vsel %vm1226_vm11, %v4108_v36, %v1227_v15 }
 0x1e3   : > { %2930 = vmatprep.mubr.msk.f32.mxu0 %vm3149_vm1, %v4338_v21  ;;  %v1231_v48 = vsel %vm1229_vm15, %v1230_v45, %v4112_v4  ;;  %v3083_v49 = vpop.eup %3082  ;;  %2888 = vmatmul.mubr.msk.f32.gmra.mrb[24].mxu1 %vm2281_vm9, %v2161_v13  ;;  %v1334_v1 = vxor.u32 2147483648, %v3081_v34  ;;  %vm2260_vm4 = vcmp.eq.s32.totalorder %v2255_v35, 2  ;;  %v1327_v38 = vadd.s32 3, %v1323_v44 }
 0x1e4   : > { %v1232_v11 = vsel %vm1225_vm14, %v1228_v24, %v1231_v48  ;;  %2890 = vmatprep.mubr.msk.f32.mxu1 %vm3149_vm1, %v4338_v21  ;;  %v1331_v51 = vxor.u32 2147483648, %v3083_v49  ;;  %vm2257_vm12 = vcmp.eq.s32.totalorder %v2255_v35, 0  ;;  %vm2256_vm0 = vcmp.lt.s32.totalorder %v2255_v35, 2 }
 0x1e5   : > { %v1233_v54 = vsel %vm1222_vm10, nan, %v1232_v11  ;;  %v2262_v16 = vsel %vm2260_vm4, %v1334_v1, %v3083_v49  ;;  %v1328_v4 = vand.u32 3, %v1327_v38  ;;  %vm1326_vm2 = vweird.f32 %v3332_v14  ;;  %v2768_v14 = vld [vmem:[%s4297_s4] ss:$0 sm:$0xff] }
 0x1e6   : > { %2931 = vmatmul.mubr.msk.f32.gmra.mrb[22].mxu0 %vm2281_vm9, %v1233_v54  ;;  %v2259_v36 = vsel %vm2257_vm12, %v3081_v34, %v1331_v51 }
 0x1e7   : > { %2933 = vmatprep.mubr.msk.f32.mxu0 %vm3149_vm1, %v4338_v21  ;;  %v2263_v40 = vsel %vm2256_vm0, %v2259_v36, %v2262_v16  ;;  %vm1330_vm13 = vcmp.eq.s32.totalorder %v1328_v4, 0  ;;  %vm1333_vm5 = vcmp.eq.s32.totalorder %v1328_v4, 2  ;;  %vm1329_vm7 = vcmp.lt.s32.totalorder %v1328_v4, 2 }
 0x1e8   : > { %v2264_v50 = vsel %vm1326_vm2, nan, %v2263_v40  ;;  %v1332_v28 = vsel %vm1330_vm13, %v3081_v34, %v1331_v51  ;;  %v1335_v9 = vsel %vm1333_vm5, %v1334_v1, %v3083_v49 }
 0x1e9   : > { %2891 = vmatmul.mubr.msk.f32.gmra.mrb[26].mxu1 %vm2281_vm9, %v2264_v50  ;;  %v1336_v31 = vsel %vm1329_vm7, %v1332_v28, %v1335_v9 }
 0x1ea   : > { %v1337_v7 = vsel %vm1326_vm2, nan, %v1336_v31 }
 0x1eb   : > { %2934 = vmatmul.mubr.msk.f32.gmra.mrb[24].mxu0 %vm2281_vm9, %v1337_v7 }
 0x287   : > { %v2375_v21 = vpop.f32.mrb[10].mxu1 }
 0x288   : > { %v2868_v6 = vpop.f32.mrb[11].mxu1 }
 0x28a   : > { %v2512_v33 = vpop.f32.mrb[8].mxu0 }
 0x28b   : > { %v2513_v53 = vadd.f32 %v2512_v33, %v2375_v21  ;;  %v2911_v23 = vpop.f32.mrb[9].mxu0 }
 0x28d   : > { %v2563_v47 = vadd.f32 %v2768_v14, %v2513_v53 }
 0x28f   : > { %2572 = vst [vmem:[%s4219_s25] sm:$0xff] %v2563_v47 }
 0x290   : > { %v2380_v10 = vpop.f32.mrb[12].mxu1 }
 0x291   : > { %v2871_v30 = vpop.f32.mrb[13].mxu1 }
 0x295   : > { %v2517_v52 = vpop.f32.mrb[10].mxu0 }
 0x296   : > { %v2518_v61 = vadd.f32 %v2517_v52, %v2380_v10  ;;  %v2914_v59 = vpop.f32.mrb[11].mxu0 }
 0x297   : > { %v2385_v37 = vpop.f32.mrb[14].mxu1 }
 0x298   : > { %v2564_v58 = vadd.f32 %v2768_v14, %v2518_v61  ;;  %v2874_v26 = vpop.f32.mrb[15].mxu1 }
 0x29a   : > { %2573 = vst [vmem:[%s4219_s25 + $0x8] sm:$0xff] %v2564_v58 }
 0x29c   : > { %v2522_v19 = vpop.f32.mrb[12].mxu0 }
 0x29d   : > { %v2523_v39 = vadd.f32 %v2522_v19, %v2385_v37  ;;  %v2917_v55 = vpop.f32.mrb[13].mxu0 }
 0x29f   : > { %v2565_v12 = vadd.f32 %v2768_v14, %v2523_v39  ;;  %v2390_v41 = vpop.f32.mrb[16].mxu1 }
 0x2a0   : > { %v2877_v43 = vpop.f32.mrb[17].mxu1 }
 0x2a1   : > { %2574 = vst [vmem:[%s4219_s25 + $0x10] sm:$0xff] %v2565_v12 }
 0x2a2   : > { %v2527_v63 = vpop.f32.mrb[14].mxu0 }
 0x2a3   : > { %v2528_v8 = vadd.f32 %v2527_v63, %v2390_v41  ;;  %v2920_v17 = vpop.f32.mrb[15].mxu0 }
 0x2a5   : > { %v2566_v32 = vadd.f32 %v2768_v14, %v2528_v8  ;;  %v2395_v22 = vpop.f32.mrb[18].mxu1 }
 0x2a6   : > { %v2880_v18 = vpop.f32.mrb[19].mxu1 }
 0x2a7   : > { %2575 = vst [vmem:[%s4219_s25 + $0x18] sm:$0xff] %v2566_v32 }
 0x2ab   : > { %v2532_v27 = vpop.f32.mrb[16].mxu0  ;;  %v2400_v60 = vpop.f32.mrb[20].mxu1 }
 0x2ac   : > { %v2533_v15 = vadd.f32 %v2532_v27, %v2395_v22  ;;  %v2923_v62 = vpop.f32.mrb[17].mxu0  ;;  %v2883_v45 = vpop.f32.mrb[21].mxu1 }
 0x2ae   : > { %v2567_v25 = vadd.f32 %v2768_v14, %v2533_v15 }
 0x2af   : > { %v2537_v56 = vpop.f32.mrb[18].mxu0 }
 0x2b0   : > { %2576 = vst [vmem:[%s4219_s25 + $0x20] sm:$0xff] %v2567_v25  ;;  %v2538_v44 = vadd.f32 %v2537_v56, %v2400_v60  ;;  %v2926_v42 = vpop.f32.mrb[19].mxu0 }
 0x2b1   : > { %v2405_v20 = vpop.f32.mrb[22].mxu1 }
 0x2b2   : > { %v2568_v29 = vadd.f32 %v2768_v14, %v2538_v44  ;;  %v2886_v3 = vpop.f32.mrb[23].mxu1 }
 0x2b4   : > { %2577 = vst [vmem:[%s4219_s25 + $0x28] sm:$0xff] %v2568_v29 }
 0x2b5   : > { %v2542_v2 = vpop.f32.mrb[20].mxu0 }
 0x2b6   : > { %v2543_v57 = vadd.f32 %v2542_v2, %v2405_v20  ;;  %v2929_v46 = vpop.f32.mrb[21].mxu0  ;;  %v2410_v5 = vpop.f32.mrb[24].mxu1 }
 0x2b7   : > { %v2889_v0 = vpop.f32.mrb[25].mxu1 }
 0x2b8   : > { %v2569_v35 = vadd.f32 %v2768_v14, %v2543_v57 }
 0x2b9   : > { %v2547_v34 = vpop.f32.mrb[22].mxu0 }
 0x2ba   : > { %2578 = vst [vmem:[%s4219_s25 + $0x30] sm:$0xff] %v2569_v35  ;;  %v2548_v13 = vadd.f32 %v2547_v34, %v2410_v5  ;;  %v2932_v24 = vpop.f32.mrb[23].mxu0 }
 0x2bc   : > { %v2570_v48 = vadd.f32 %v2768_v14, %v2548_v13  ;;  %v2415_v49 = vpop.f32.mrb[26].mxu1 }
 0x2bd   : > { %v2892_v11 = vpop.f32.mrb[27].mxu1  ;;  %2588 = sbr.rel (!%p3228_p5) target bundleno = 736 (0x2e0), region = 44 }
 0x2be   : > { %2579 = vst [vmem:[%s4219_s25 + $0x38] sm:$0xff] %v2570_v48  ;;  %v2552_v1 = vpop.f32.mrb[24].mxu0 }
 0x2bf   : > { %v2553_v54 = vadd.f32 %v2552_v1, %v2415_v49  ;;  %v2935_v51 = vpop.f32.mrb[25].mxu0 }
 0x2c1   : > { %v2571_v38 = vadd.f32 %v2768_v14, %v2553_v54 }
 0x2c3   : > { %2580 = vst [vmem:[%s4219_s25 + $0x40] sm:$0xff] %v2571_v38 }
 0x2c4   : > { %s4349_s30 = smov (!%p2591_p11, %s2590_s30), 9 }
 0x2c5   : > { %s4237_s6 = sshll.u32 %s4349_s30, 7 }
 0x2c6   : > { %s2595_s8 = ssub.s32 1152, %s4237_s6 }
 0x2c7   : > { %2596 = vsyncadd %s4232_s26, %s2595_s8  ;;  %p2770_p12 = scmp.ne.s32.totalorder %s4237_s6, 0  ;;  %s2776_s9 = smul.u32 1152, %s3211_s22 }
 0x2c8   : > { %s2601_s10 = sshll.u32 %s4219_s25, 4  ;;  %s3157_s13 = smov [#allocation2]   ;;  %s4249_s10 = int_to_ptr.vmem [resolvable:$true] %s2601_s10 }
 0x2c9   : > { %s4247_s12 = scalar_lea.hbm %s4298_s5, %s2776_s9  ;;  %s3084_s7 = scalar_lea.vmem %s4249_s10, %s4237_s6 }
 0x2ca   : > { %p3085_p13 = scmp.ne.s32.totalorder %s4249_s10, %s3084_s7  ;;  %s3088_s14 = sshll.u32 %s3157_s13, 4  ;;  %s3089_s14 = int_to_ptr.vmem [resolvable:$false] %s3088_s14 }
 0x2cb   : > { %s3090_s22 = scalar_lea.vmem %s3089_s14, 2304  ;;  %p3091_p2 = scmp.lt.s32.totalorder %s4249_s10, %s3089_s14 }
 0x2cc   : > { %p3086_p0 = pnand %p3085_p13, %p2770_p12  ;;  %p3092_p3 = scmp.lt.s32.totalorder %s3090_s22, %s3084_s7 }
 0x2ce   : > { %p3087_p1 = pneg %p3086_p0  ;;  %p3093_p4 = por %p3092_p3, %p3091_p2 }
 0x2d0   : > { %p3094_p5 = pnand %p3093_p4, %p3087_p1 }
 0x2d2   : > { %3097 = shalt.err (!%p3094_p5)
}
 0x2d3   : > { %s3098_s15 = scalar_lea.hbm %s4247_s12, %s4237_s6  ;;  %s3102_s23 = scalar_lea.hbm %s4298_s5, 2176 }
 0x2d4   : > { %p3099_p7 = scmp.ne.s32.totalorder %s4247_s12, %s3098_s15  ;;  %p3103_p10 = scmp.lt.u32.totalorder %s4247_s12, %s4298_s5 }
 0x2d5   : > { %p3104_p11 = scmp.lt.u32.totalorder %s3102_s23, %s3098_s15  ;;  %p3106_p0 = scmp.lt.u32.totalorder %s3098_s15, %s4247_s12 }
 0x2d6   : > { %p3100_p8 = pnand %p3099_p7, %p2770_p12 }
 0x2d7   : > { %p3105_p13 = por %p3104_p11, %p3103_p10 }
 0x2d8   : > { %p3101_p9 = pneg %p3100_p8 }
 0x2d9   : > { %p3107_p1 = por %p3106_p0, %p3105_p13 }
 0x2db   : > { %p3108_p2 = pnand %p3107_p1, %p3101_p9 }
 0x2dd   : > { %3111 = shalt.err (!%p3108_p2)
}
 0x2de   : > { %s3158_s8 = smov 128   ;;  %s3159_s9 = smov 8  }
 0x2df   : > { %2607 = dma.vmem_to_hbm [thread:$0]  (%p2770_p12), %s4249_s10, %s4237_s6, %s4247_s12, %s4232_s26, %s3158_s8, %s3158_s8, %s3159_s9  }
 0x2e0 PF: > { %p3004_p3 = scmp.ge.s32.totalorder %s3146_s21, 2  ;;  %s2616_s28 = sand.u32 1, %s3134_s18  }
 0x2e1   : > { %s2617_s11 = scalar_lea.sflag [#allocation3], %s2616_s28 }
 0x2e2   : > { %p3001_p4 = pnand %p3004_p3, %p3232_p6 }
 0x2e4   : > { %3129 = dma.done.wait (!%p3001_p4), %s2617_s11, 1152  }
 0x2e5   : > { %3131 = vsyncadd (!%p3001_p4), %s2617_s11, 4294966144  ;;  %p15_p5 = scmp.ge.s32.totalorder %s3215_s24, 4   ;;  %s4344_s18 = smov %s3138_s19 }
 0x2e6   : > { %s4345_s19 = smov %s3142_s20  ;;  %s4346_s20 = smov %s3226_s27 }
 0x2e7   : > { %s4347_s21 = smov %s3215_s24  ;;  %17 = sbr.rel (!%p15_p5) target bundleno = 3 (0x3), region = 75 }
 0x2ee   :  { %2622 = vsyncpa [#allocation3], 1 }
 0x2ef   :  { %2624 = vsyncpa [#allocation3 + $0x1], 1 }

</bundles_post_ra>
